<compile_context>
chip_gen: v5e
topology: v5e:2x2
jax: 0.10.0
libtpu: 0.0.40
codegen_flags: <defaults>
</compile_context>

<pallas_src>
import functools

import jax
import jax.numpy as jnp
import numpy as np
from jax.experimental import pallas as pl
from jax.experimental.pallas import tpu as pltpu


# ----------------------------------------------------------------------------
# Fused kernel: graph conv + gcn1 bias/relu + gcn2 + temporal conv + FC head.
# One batch element per grid step; every heavy stage is one lane-dense MXU matmul.
# ----------------------------------------------------------------------------
def stgcn_fused_kernel(z_ref, ablk_ref, b1_ref, w2_ref, b2_ref, wt_ref, bt_ref,
                       wfc_ref, bfc_ref, o_ref, *, V):
    TV, C1 = z_ref.shape
    C2 = w2_ref.shape[1]
    ncls = o_ref.shape[-1]

    # Graph conv over all T frames as one block-diagonal matmul (kron(I_T, A)),
    # then gcn1 bias + ReLU (the gcn1 weight was already applied in the wrapper).
    g = jnp.dot(ablk_ref[...], z_ref[...], preferred_element_type=jnp.float32)   # (TV, C1)
    h1 = jnp.maximum(g + b1_ref[...], 0.0)

    # gcn2 1x1 conv: single (TV, C1) @ (C1, C2) matmul.
    h2 = jnp.maximum(
        jnp.dot(h1, w2_ref[...], preferred_element_type=jnp.float32) + b2_ref[...],
        0.0)                                                                      # (TV, C2)

    # Temporal conv, kernel (3, 1), padding (1, 0): one matmul against all 3 taps,
    # then shift on the OUTPUT side (two small copies, no input-side concatenates).
    y = jnp.dot(h2, wt_ref[...], preferred_element_type=jnp.float32)             # (TV, 3*C2)
    y0 = y[:, :C2]           # W_0 @ h2[t]  -> contributes to output frame t+1
    y1 = y[:, C2:2 * C2]     # W_1 @ h2[t]  -> output frame t
    y2 = y[:, 2 * C2:]       # W_2 @ h2[t]  -> contributes to output frame t-1
    zv = jnp.zeros((V, C2), jnp.float32)
    tc = (y1
          + jnp.concatenate([zv, y0[:TV - V, :]], axis=0)       # shift down one frame
          + jnp.concatenate([y2[V:, :], zv], axis=0)            # shift up one frame
          + bt_ref[...])                                         # (TV, C2)

    # Fused FC head: out[n] = <tc, wfc[n]>_F + bfc[n].  ncls is tiny, so a per-class
    # elementwise multiply + reduction (VPU/XLU) is used instead of flattening tc to
    # (1, TV*C2) for an MXU matvec -- same FLOPs, no lane-merging relayout, and it
    # removes the second pallas_call + HBM round trip entirely.
    lane = jax.lax.broadcasted_iota(jnp.int32, (1, ncls), 1)     # (1, ncls)
    acc = bfc_ref[...]                                           # (1, ncls)
    for n in range(ncls):                                        # static unroll
        prod = tc * wfc_ref[n]                                   # (TV, C2) VPU
        s = jnp.sum(prod, axis=0, keepdims=True)                 # (1, C2) sublane reduce
        s = jnp.sum(s, axis=1, keepdims=True)                    # (1, 1)  lane reduce
        acc = acc + jnp.where(lane == n, s, 0.0)
    o_ref[...] = acc


# ----------------------------------------------------------------------------
# Wrapper: layout glue (XLA) + one pallas_call.
# ----------------------------------------------------------------------------
def stgcn_forward(x, adjacency, params):
    """x: (B, Cin, T, V) float32 (PyTorch NCHW), adjacency: (V, V)."""
    B, Cin, T, V = x.shape
    C1 = params["gcn1_w"].shape[0]
    C2 = params["gcn2_w"].shape[0]
    ncls = params["fc_b"].shape[0]
    TV = T * V
    f32 = jnp.float32

    # glue: NCHW -> channels-last slab, with the K=Cin gcn1 1x1 conv folded in.
    x_slab = jnp.transpose(x, (0, 2, 3, 1)).reshape(B, TV, Cin).astype(f32)
    w1 = params["gcn1_w"][:, :, 0, 0].astype(f32).T              # (Cin, C1)
    z_slab = x_slab @ w1                                         # (B, TV, C1)

    # glue: block-diagonal adjacency applies A to every frame with one matmul.
    # TODO(synk): at production T (hundreds of frames) replace kron(I_T, A) with a
    # per-frame (V, V) graph conv -- this operand grows as (T*V)^2.
    ablk = jnp.kron(jnp.eye(T, dtype=f32), adjacency.astype(f32))  # (TV, TV)

    b1 = params["gcn1_b"].astype(f32)[None, :]                   # (1, C1)
    w2 = params["gcn2_w"][:, :, 0, 0].astype(f32).T              # (C1, C2)
    b2 = params["gcn2_b"].astype(f32)[None, :]                   # (1, C2)
    # temporal taps as columns [W0^T | W1^T | W2^T]: h2 @ wt gives all 3 taps at once.
    wt = jnp.transpose(params["tconv_w"][:, :, :, 0].astype(f32),
                       (1, 2, 0)).reshape(C2, 3 * C2)            # (C2, 3*C2)
    bt = params["tconv_b"].astype(f32)[None, :]                  # (1, C2)
    # FC weight: PyTorch (c, t, v) flatten order permuted to the kernel's (t, v, c)
    # slab order, kept 3-D so the kernel indexes one (TV, C2) plane per class.
    wfc = (params["fc_w"].astype(f32).reshape(ncls, C2, T, V)
           .transpose(0, 2, 3, 1).reshape(ncls, TV, C2))         # (ncls, TV, C2)
    bfc = params["fc_b"].astype(f32)[None, :]                    # (1, ncls)

    out = pl.pallas_call(
        functools.partial(stgcn_fused_kernel, V=V),
        out_shape=jax.ShapeDtypeStruct((B, 1, ncls), f32),
        grid=(B,),
        in_specs=[
            pl.BlockSpec((None, TV, C1), lambda b: (b, 0, 0)),   # z (per batch element)
            pl.BlockSpec((TV, TV), lambda b: (0, 0)),            # block-diag adjacency
            pl.BlockSpec((1, C1), lambda b: (0, 0)),             # gcn1 bias
            pl.BlockSpec((C1, C2), lambda b: (0, 0)),            # gcn2 weight
            pl.BlockSpec((1, C2), lambda b: (0, 0)),             # gcn2 bias
            pl.BlockSpec((C2, 3 * C2), lambda b: (0, 0)),        # temporal taps
            pl.BlockSpec((1, C2), lambda b: (0, 0)),             # temporal bias
            pl.BlockSpec((ncls, TV, C2), lambda b: (0, 0, 0)),   # FC weight (permuted)
            pl.BlockSpec((1, ncls), lambda b: (0, 0)),           # FC bias
        ],
        out_specs=pl.BlockSpec((None, 1, ncls), lambda b: (b, 0, 0)),
        compiler_params=pltpu.CompilerParams(dimension_semantics=("parallel",)),
    )(z_slab, ablk, b1, w2, b2, wt, bt, wfc, bfc)
    return out.reshape(B, ncls)


# ----------------------------------------------------------------------------
# Pure-JAX reference (mirrors the PyTorch forward exactly)
# ----------------------------------------------------------------------------
def ref_forward(x, A, params):
    B, Cin, T, V = x.shape
    xg = jnp.einsum("bctv,nv->bctn", x, A)
    w1 = params["gcn1_w"][:, :, 0, 0]
    h1 = jax.nn.relu(jnp.einsum("oc,bctn->botn", w1, xg)
                     + params["gcn1_b"][None, :, None, None])
    w2 = params["gcn2_w"][:, :, 0, 0]
    h2 = jax.nn.relu(jnp.einsum("oc,bctn->botn", w2, h1)
                     + params["gcn2_b"][None, :, None, None])
    h2p = jnp.pad(h2, ((0, 0), (0, 0), (1, 1), (0, 0)))
    wt = params["tconv_w"][:, :, :, 0]  # (O, C, 3)
    tc = sum(jnp.einsum("oc,bctn->botn", wt[:, :, k], h2p[:, :, k:k + T, :])
             for k in range(3))
    tc = tc + params["tconv_b"][None, :, None, None]
    flat = tc.reshape(B, -1)
    return flat @ params["fc_w"].T + params["fc_b"]


if __name__ == "__main__":
    B, Cin, T, V, ncls = 2, 2, 8, 16, 12  # small shapes consistent with STGCN
    key = jax.random.PRNGKey(0)
    ks = jax.random.split(key, 10)

    x = jax.random.normal(ks[0], (B, Cin, T, V), jnp.float32)
    A = jax.random.normal(ks[1], (V, V), jnp.float32) * 0.3

    params = dict(
        gcn1_w=jax.random.normal(ks[2], (64, Cin, 1, 1), jnp.float32) * 0.2,
        gcn1_b=jax.random.normal(ks[3], (64,), jnp.float32) * 0.1,
        gcn2_w=jax.random.normal(ks[4], (128, 64, 1, 1), jnp.float32) * 0.05,
        gcn2_b=jax.random.normal(ks[5], (128,), jnp.float32) * 0.1,
        tconv_w=jax.random.normal(ks[6], (128, 128, 3, 1), jnp.float32) * 0.03,
        tconv_b=jax.random.normal(ks[7], (128,), jnp.float32) * 0.1,
        fc_w=jax.random.normal(ks[8], (ncls, 128 * T * V), jnp.float32) * 0.01,
        fc_b=jax.random.normal(ks[9], (ncls,), jnp.float32) * 0.1,
    )

    out = stgcn_forward(x, A, params)
    out = jax.block_until_ready(out)
    assert out.shape == (B, ncls)

    ref = ref_forward(x, A, params)
    np.testing.assert_allclose(np.asarray(out), np.asarray(ref), rtol=2e-3, atol=2e-3)

    print("KERNEL_OK")
</pallas_src>

<mosaic_0001>
module attributes {stable_mosaic.version = 11 : i64} {
  func.func @stgcn_fused_kernel(%arg0: i32, %arg1: memref<1x128x64xf32, #tpu.memory_space<vmem>>, %arg2: memref<128x128xf32, #tpu.memory_space<vmem>>, %arg3: memref<1x64xf32, #tpu.memory_space<vmem>>, %arg4: memref<64x128xf32, #tpu.memory_space<vmem>>, %arg5: memref<1x128xf32, #tpu.memory_space<vmem>>, %arg6: memref<128x384xf32, #tpu.memory_space<vmem>>, %arg7: memref<1x128xf32, #tpu.memory_space<vmem>>, %arg8: memref<12x128x128xf32, #tpu.memory_space<vmem>>, %arg9: memref<1x12xf32, #tpu.memory_space<vmem>>, %arg10: memref<1x1x12xf32, #tpu.memory_space<vmem>>) attributes {dimension_semantics = [#tpu.dimension_semantics<parallel>], iteration_bounds = array<i64: 2>, scalar_prefetch = 0 : i64, scratch_operands = 0 : i64, tpu.core_type = #tpu.core_type<tc>, window_params = [{transform_indices = @transform_0, window_bounds = array<i64: 1, 128, 64>}, {pipeline_mode = #tpu.pipeline_mode<synchronous>, transform_indices = @transform_1, window_bounds = array<i64: 128, 128>}, {pipeline_mode = #tpu.pipeline_mode<synchronous>, transform_indices = @transform_2, window_bounds = array<i64: 1, 64>}, {pipeline_mode = #tpu.pipeline_mode<synchronous>, transform_indices = @transform_3, window_bounds = array<i64: 64, 128>}, {pipeline_mode = #tpu.pipeline_mode<synchronous>, transform_indices = @transform_4, window_bounds = array<i64: 1, 128>}, {pipeline_mode = #tpu.pipeline_mode<synchronous>, transform_indices = @transform_5, window_bounds = array<i64: 128, 384>}, {pipeline_mode = #tpu.pipeline_mode<synchronous>, transform_indices = @transform_6, window_bounds = array<i64: 1, 128>}, {pipeline_mode = #tpu.pipeline_mode<synchronous>, transform_indices = @transform_7, window_bounds = array<i64: 12, 128, 128>}, {pipeline_mode = #tpu.pipeline_mode<synchronous>, transform_indices = @transform_8, window_bounds = array<i64: 1, 12>}, {transform_indices = @transform_9, window_bounds = array<i64: 1, 1, 12>}]} {
    %c0 = arith.constant 0 : index
    %c0_0 = arith.constant 0 : index
    %0 = vector.load %arg2[%c0, %c0_0] : memref<128x128xf32, #tpu.memory_space<vmem>>, vector<128x128xf32>
    %c0_1 = arith.constant 0 : index
    %c0_2 = arith.constant 0 : index
    %c0_3 = arith.constant 0 : index
    %1 = vector.load %arg1[%c0_1, %c0_2, %c0_3] : memref<1x128x64xf32, #tpu.memory_space<vmem>>, vector<1x128x64xf32>
    %2 = vector.shape_cast %1 : vector<1x128x64xf32> to vector<128x64xf32>
    %cst = arith.constant dense<0.000000e+00> : vector<128x64xf32>
    %3 = tpu.matmul %0, %2, %cst {dimension_numbers = #tpu.dot_dimension_numbers<[1], [0], [0], [1], [0, 0, 1, 1], [], []>} : vector<128x128xf32>, vector<128x64xf32>, vector<128x64xf32> -> vector<128x64xf32>
    %c0_4 = arith.constant 0 : index
    %c0_5 = arith.constant 0 : index
    %4 = vector.load %arg3[%c0_4, %c0_5] : memref<1x64xf32, #tpu.memory_space<vmem>>, vector<1x64xf32>
    %5 = vector.broadcast %4 : vector<1x64xf32> to vector<128x64xf32>
    %6 = arith.addf %3, %5 : vector<128x64xf32>
    %cst_6 = arith.constant 0.000000e+00 : f32
    %7 = vector.broadcast %cst_6 : f32 to vector<128x64xf32>
    %8 = arith.maximumf %6, %7 : vector<128x64xf32>
    %c0_7 = arith.constant 0 : index
    %c0_8 = arith.constant 0 : index
    %9 = vector.load %arg4[%c0_7, %c0_8] : memref<64x128xf32, #tpu.memory_space<vmem>>, vector<64x128xf32>
    %cst_9 = arith.constant dense<0.000000e+00> : vector<128x128xf32>
    %10 = tpu.matmul %8, %9, %cst_9 {dimension_numbers = #tpu.dot_dimension_numbers<[1], [0], [0], [1], [0, 0, 1, 1], [], []>} : vector<128x64xf32>, vector<64x128xf32>, vector<128x128xf32> -> vector<128x128xf32>
    %c0_10 = arith.constant 0 : index
    %c0_11 = arith.constant 0 : index
    %11 = vector.load %arg5[%c0_10, %c0_11] : memref<1x128xf32, #tpu.memory_space<vmem>>, vector<1x128xf32>
    %12 = vector.broadcast %11 : vector<1x128xf32> to vector<128x128xf32>
    %13 = arith.addf %10, %12 : vector<128x128xf32>
    %cst_12 = arith.constant 0.000000e+00 : f32
    %14 = vector.broadcast %cst_12 : f32 to vector<128x128xf32>
    %15 = arith.maximumf %13, %14 : vector<128x128xf32>
    %c0_13 = arith.constant 0 : index
    %c0_14 = arith.constant 0 : index
    %16 = vector.load %arg6[%c0_13, %c0_14] : memref<128x384xf32, #tpu.memory_space<vmem>>, vector<128x384xf32>
    %cst_15 = arith.constant dense<0.000000e+00> : vector<128x384xf32>
    %17 = tpu.matmul %15, %16, %cst_15 {dimension_numbers = #tpu.dot_dimension_numbers<[1], [0], [0], [1], [0, 0, 1, 1], [], []>} : vector<128x128xf32>, vector<128x384xf32>, vector<128x384xf32> -> vector<128x384xf32>
    %18 = vector.extract_strided_slice %17 {offsets = [0, 0], sizes = [128, 128], strides = [1, 1]} : vector<128x384xf32> to vector<128x128xf32>
    %19 = vector.extract_strided_slice %17 {offsets = [0, 128], sizes = [128, 128], strides = [1, 1]} : vector<128x384xf32> to vector<128x128xf32>
    %20 = vector.extract_strided_slice %17 {offsets = [0, 256], sizes = [128, 128], strides = [1, 1]} : vector<128x384xf32> to vector<128x128xf32>
    %cst_16 = arith.constant 0.000000e+00 : f32
    %21 = vector.broadcast %cst_16 : f32 to vector<16x128xf32>
    %22 = vector.extract_strided_slice %18 {offsets = [0, 0], sizes = [112, 128], strides = [1, 1]} : vector<128x128xf32> to vector<112x128xf32>
    %23 = tpu.concatenate %21, %22 in 0 : vector<16x128xf32>, vector<112x128xf32> -> vector<128x128xf32>
    %24 = arith.addf %19, %23 : vector<128x128xf32>
    %25 = vector.extract_strided_slice %20 {offsets = [16, 0], sizes = [112, 128], strides = [1, 1]} : vector<128x128xf32> to vector<112x128xf32>
    %26 = tpu.concatenate %25, %21 in 0 : vector<112x128xf32>, vector<16x128xf32> -> vector<128x128xf32>
    %27 = arith.addf %24, %26 : vector<128x128xf32>
    %c0_17 = arith.constant 0 : index
    %c0_18 = arith.constant 0 : index
    %28 = vector.load %arg7[%c0_17, %c0_18] : memref<1x128xf32, #tpu.memory_space<vmem>>, vector<1x128xf32>
    %29 = vector.broadcast %28 : vector<1x128xf32> to vector<128x128xf32>
    %30 = arith.addf %27, %29 : vector<128x128xf32>
    %31 = tpu.iota {dimensions = array<i32: 1>} : vector<1x12xi32>
    %c0_19 = arith.constant 0 : index
    %c0_20 = arith.constant 0 : index
    %32 = vector.load %arg9[%c0_19, %c0_20] : memref<1x12xf32, #tpu.memory_space<vmem>>, vector<1x12xf32>
    %c0_21 = arith.constant 0 : index
    %c0_22 = arith.constant 0 : index
    %c0_23 = arith.constant 0 : index
    %33 = vector.load %arg8[%c0_21, %c0_22, %c0_23] : memref<12x128x128xf32, #tpu.memory_space<vmem>>, vector<1x128x128xf32>
    %34 = vector.shape_cast %33 : vector<1x128x128xf32> to vector<128x128xf32>
    %35 = arith.mulf %30, %34 : vector<128x128xf32>
    %cst_24 = arith.constant dense<0.000000e+00> : vector<128xf32>
    %36 = vector.multi_reduction <add>, %35, %cst_24 [0] : vector<128x128xf32> to vector<128xf32>
    %37 = vector.shape_cast %36 : vector<128xf32> to vector<1x128xf32>
    %cst_25 = arith.constant dense<0.000000e+00> : vector<1xf32>
    %38 = vector.multi_reduction <add>, %37, %cst_25 [1] : vector<1x128xf32> to vector<1xf32>
    %39 = vector.shape_cast %38 : vector<1xf32> to vector<1x1xf32>
    %c0_i32 = arith.constant 0 : i32
    %40 = vector.broadcast %c0_i32 : i32 to vector<1x12xi32>
    %41 = arith.cmpi eq, %31, %40 : vector<1x12xi32>
    %cst_26 = arith.constant 0.000000e+00 : f32
    %42 = vector.shape_cast %39 : vector<1x1xf32> to vector<1x1xf32>
    %43 = vector.broadcast %42 : vector<1x1xf32> to vector<1x12xf32>
    %44 = vector.broadcast %cst_26 : f32 to vector<1x12xf32>
    %45 = arith.select %41, %43, %44 : vector<1x12xi1>, vector<1x12xf32>
    %46 = arith.addf %32, %45 : vector<1x12xf32>
    %c1 = arith.constant 1 : index
    %c0_27 = arith.constant 0 : index
    %c0_28 = arith.constant 0 : index
    %47 = vector.load %arg8[%c1, %c0_27, %c0_28] : memref<12x128x128xf32, #tpu.memory_space<vmem>>, vector<1x128x128xf32>
    %48 = vector.shape_cast %47 : vector<1x128x128xf32> to vector<128x128xf32>
    %49 = arith.mulf %30, %48 : vector<128x128xf32>
    %cst_29 = arith.constant dense<0.000000e+00> : vector<128xf32>
    %50 = vector.multi_reduction <add>, %49, %cst_29 [0] : vector<128x128xf32> to vector<128xf32>
    %51 = vector.shape_cast %50 : vector<128xf32> to vector<1x128xf32>
    %cst_30 = arith.constant dense<0.000000e+00> : vector<1xf32>
    %52 = vector.multi_reduction <add>, %51, %cst_30 [1] : vector<1x128xf32> to vector<1xf32>
    %53 = vector.shape_cast %52 : vector<1xf32> to vector<1x1xf32>
    %c1_i32 = arith.constant 1 : i32
    %54 = vector.broadcast %c1_i32 : i32 to vector<1x12xi32>
    %55 = arith.cmpi eq, %31, %54 : vector<1x12xi32>
    %cst_31 = arith.constant 0.000000e+00 : f32
    %56 = vector.shape_cast %53 : vector<1x1xf32> to vector<1x1xf32>
    %57 = vector.broadcast %56 : vector<1x1xf32> to vector<1x12xf32>
    %58 = vector.broadcast %cst_31 : f32 to vector<1x12xf32>
    %59 = arith.select %55, %57, %58 : vector<1x12xi1>, vector<1x12xf32>
    %60 = arith.addf %46, %59 : vector<1x12xf32>
    %c2 = arith.constant 2 : index
    %c0_32 = arith.constant 0 : index
    %c0_33 = arith.constant 0 : index
    %61 = vector.load %arg8[%c2, %c0_32, %c0_33] : memref<12x128x128xf32, #tpu.memory_space<vmem>>, vector<1x128x128xf32>
    %62 = vector.shape_cast %61 : vector<1x128x128xf32> to vector<128x128xf32>
    %63 = arith.mulf %30, %62 : vector<128x128xf32>
    %cst_34 = arith.constant dense<0.000000e+00> : vector<128xf32>
    %64 = vector.multi_reduction <add>, %63, %cst_34 [0] : vector<128x128xf32> to vector<128xf32>
    %65 = vector.shape_cast %64 : vector<128xf32> to vector<1x128xf32>
    %cst_35 = arith.constant dense<0.000000e+00> : vector<1xf32>
    %66 = vector.multi_reduction <add>, %65, %cst_35 [1] : vector<1x128xf32> to vector<1xf32>
    %67 = vector.shape_cast %66 : vector<1xf32> to vector<1x1xf32>
    %c2_i32 = arith.constant 2 : i32
    %68 = vector.broadcast %c2_i32 : i32 to vector<1x12xi32>
    %69 = arith.cmpi eq, %31, %68 : vector<1x12xi32>
    %cst_36 = arith.constant 0.000000e+00 : f32
    %70 = vector.shape_cast %67 : vector<1x1xf32> to vector<1x1xf32>
    %71 = vector.broadcast %70 : vector<1x1xf32> to vector<1x12xf32>
    %72 = vector.broadcast %cst_36 : f32 to vector<1x12xf32>
    %73 = arith.select %69, %71, %72 : vector<1x12xi1>, vector<1x12xf32>
    %74 = arith.addf %60, %73 : vector<1x12xf32>
    %c3 = arith.constant 3 : index
    %c0_37 = arith.constant 0 : index
    %c0_38 = arith.constant 0 : index
    %75 = vector.load %arg8[%c3, %c0_37, %c0_38] : memref<12x128x128xf32, #tpu.memory_space<vmem>>, vector<1x128x128xf32>
    %76 = vector.shape_cast %75 : vector<1x128x128xf32> to vector<128x128xf32>
    %77 = arith.mulf %30, %76 : vector<128x128xf32>
    %cst_39 = arith.constant dense<0.000000e+00> : vector<128xf32>
    %78 = vector.multi_reduction <add>, %77, %cst_39 [0] : vector<128x128xf32> to vector<128xf32>
    %79 = vector.shape_cast %78 : vector<128xf32> to vector<1x128xf32>
    %cst_40 = arith.constant dense<0.000000e+00> : vector<1xf32>
    %80 = vector.multi_reduction <add>, %79, %cst_40 [1] : vector<1x128xf32> to vector<1xf32>
    %81 = vector.shape_cast %80 : vector<1xf32> to vector<1x1xf32>
    %c3_i32 = arith.constant 3 : i32
    %82 = vector.broadcast %c3_i32 : i32 to vector<1x12xi32>
    %83 = arith.cmpi eq, %31, %82 : vector<1x12xi32>
    %cst_41 = arith.constant 0.000000e+00 : f32
    %84 = vector.shape_cast %81 : vector<1x1xf32> to vector<1x1xf32>
    %85 = vector.broadcast %84 : vector<1x1xf32> to vector<1x12xf32>
    %86 = vector.broadcast %cst_41 : f32 to vector<1x12xf32>
    %87 = arith.select %83, %85, %86 : vector<1x12xi1>, vector<1x12xf32>
    %88 = arith.addf %74, %87 : vector<1x12xf32>
    %c4 = arith.constant 4 : index
    %c0_42 = arith.constant 0 : index
    %c0_43 = arith.constant 0 : index
    %89 = vector.load %arg8[%c4, %c0_42, %c0_43] : memref<12x128x128xf32, #tpu.memory_space<vmem>>, vector<1x128x128xf32>
    %90 = vector.shape_cast %89 : vector<1x128x128xf32> to vector<128x128xf32>
    %91 = arith.mulf %30, %90 : vector<128x128xf32>
    %cst_44 = arith.constant dense<0.000000e+00> : vector<128xf32>
    %92 = vector.multi_reduction <add>, %91, %cst_44 [0] : vector<128x128xf32> to vector<128xf32>
    %93 = vector.shape_cast %92 : vector<128xf32> to vector<1x128xf32>
    %cst_45 = arith.constant dense<0.000000e+00> : vector<1xf32>
    %94 = vector.multi_reduction <add>, %93, %cst_45 [1] : vector<1x128xf32> to vector<1xf32>
    %95 = vector.shape_cast %94 : vector<1xf32> to vector<1x1xf32>
    %c4_i32 = arith.constant 4 : i32
    %96 = vector.broadcast %c4_i32 : i32 to vector<1x12xi32>
    %97 = arith.cmpi eq, %31, %96 : vector<1x12xi32>
    %cst_46 = arith.constant 0.000000e+00 : f32
    %98 = vector.shape_cast %95 : vector<1x1xf32> to vector<1x1xf32>
    %99 = vector.broadcast %98 : vector<1x1xf32> to vector<1x12xf32>
    %100 = vector.broadcast %cst_46 : f32 to vector<1x12xf32>
    %101 = arith.select %97, %99, %100 : vector<1x12xi1>, vector<1x12xf32>
    %102 = arith.addf %88, %101 : vector<1x12xf32>
    %c5 = arith.constant 5 : index
    %c0_47 = arith.constant 0 : index
    %c0_48 = arith.constant 0 : index
    %103 = vector.load %arg8[%c5, %c0_47, %c0_48] : memref<12x128x128xf32, #tpu.memory_space<vmem>>, vector<1x128x128xf32>
    %104 = vector.shape_cast %103 : vector<1x128x128xf32> to vector<128x128xf32>
    %105 = arith.mulf %30, %104 : vector<128x128xf32>
    %cst_49 = arith.constant dense<0.000000e+00> : vector<128xf32>
    %106 = vector.multi_reduction <add>, %105, %cst_49 [0] : vector<128x128xf32> to vector<128xf32>
    %107 = vector.shape_cast %106 : vector<128xf32> to vector<1x128xf32>
    %cst_50 = arith.constant dense<0.000000e+00> : vector<1xf32>
    %108 = vector.multi_reduction <add>, %107, %cst_50 [1] : vector<1x128xf32> to vector<1xf32>
    %109 = vector.shape_cast %108 : vector<1xf32> to vector<1x1xf32>
    %c5_i32 = arith.constant 5 : i32
    %110 = vector.broadcast %c5_i32 : i32 to vector<1x12xi32>
    %111 = arith.cmpi eq, %31, %110 : vector<1x12xi32>
    %cst_51 = arith.constant 0.000000e+00 : f32
    %112 = vector.shape_cast %109 : vector<1x1xf32> to vector<1x1xf32>
    %113 = vector.broadcast %112 : vector<1x1xf32> to vector<1x12xf32>
    %114 = vector.broadcast %cst_51 : f32 to vector<1x12xf32>
    %115 = arith.select %111, %113, %114 : vector<1x12xi1>, vector<1x12xf32>
    %116 = arith.addf %102, %115 : vector<1x12xf32>
    %c6 = arith.constant 6 : index
    %c0_52 = arith.constant 0 : index
    %c0_53 = arith.constant 0 : index
    %117 = vector.load %arg8[%c6, %c0_52, %c0_53] : memref<12x128x128xf32, #tpu.memory_space<vmem>>, vector<1x128x128xf32>
    %118 = vector.shape_cast %117 : vector<1x128x128xf32> to vector<128x128xf32>
    %119 = arith.mulf %30, %118 : vector<128x128xf32>
    %cst_54 = arith.constant dense<0.000000e+00> : vector<128xf32>
    %120 = vector.multi_reduction <add>, %119, %cst_54 [0] : vector<128x128xf32> to vector<128xf32>
    %121 = vector.shape_cast %120 : vector<128xf32> to vector<1x128xf32>
    %cst_55 = arith.constant dense<0.000000e+00> : vector<1xf32>
    %122 = vector.multi_reduction <add>, %121, %cst_55 [1] : vector<1x128xf32> to vector<1xf32>
    %123 = vector.shape_cast %122 : vector<1xf32> to vector<1x1xf32>
    %c6_i32 = arith.constant 6 : i32
    %124 = vector.broadcast %c6_i32 : i32 to vector<1x12xi32>
    %125 = arith.cmpi eq, %31, %124 : vector<1x12xi32>
    %cst_56 = arith.constant 0.000000e+00 : f32
    %126 = vector.shape_cast %123 : vector<1x1xf32> to vector<1x1xf32>
    %127 = vector.broadcast %126 : vector<1x1xf32> to vector<1x12xf32>
    %128 = vector.broadcast %cst_56 : f32 to vector<1x12xf32>
    %129 = arith.select %125, %127, %128 : vector<1x12xi1>, vector<1x12xf32>
    %130 = arith.addf %116, %129 : vector<1x12xf32>
    %c7 = arith.constant 7 : index
    %c0_57 = arith.constant 0 : index
    %c0_58 = arith.constant 0 : index
    %131 = vector.load %arg8[%c7, %c0_57, %c0_58] : memref<12x128x128xf32, #tpu.memory_space<vmem>>, vector<1x128x128xf32>
    %132 = vector.shape_cast %131 : vector<1x128x128xf32> to vector<128x128xf32>
    %133 = arith.mulf %30, %132 : vector<128x128xf32>
    %cst_59 = arith.constant dense<0.000000e+00> : vector<128xf32>
    %134 = vector.multi_reduction <add>, %133, %cst_59 [0] : vector<128x128xf32> to vector<128xf32>
    %135 = vector.shape_cast %134 : vector<128xf32> to vector<1x128xf32>
    %cst_60 = arith.constant dense<0.000000e+00> : vector<1xf32>
    %136 = vector.multi_reduction <add>, %135, %cst_60 [1] : vector<1x128xf32> to vector<1xf32>
    %137 = vector.shape_cast %136 : vector<1xf32> to vector<1x1xf32>
    %c7_i32 = arith.constant 7 : i32
    %138 = vector.broadcast %c7_i32 : i32 to vector<1x12xi32>
    %139 = arith.cmpi eq, %31, %138 : vector<1x12xi32>
    %cst_61 = arith.constant 0.000000e+00 : f32
    %140 = vector.shape_cast %137 : vector<1x1xf32> to vector<1x1xf32>
    %141 = vector.broadcast %140 : vector<1x1xf32> to vector<1x12xf32>
    %142 = vector.broadcast %cst_61 : f32 to vector<1x12xf32>
    %143 = arith.select %139, %141, %142 : vector<1x12xi1>, vector<1x12xf32>
    %144 = arith.addf %130, %143 : vector<1x12xf32>
    %c8 = arith.constant 8 : index
    %c0_62 = arith.constant 0 : index
    %c0_63 = arith.constant 0 : index
    %145 = vector.load %arg8[%c8, %c0_62, %c0_63] : memref<12x128x128xf32, #tpu.memory_space<vmem>>, vector<1x128x128xf32>
    %146 = vector.shape_cast %145 : vector<1x128x128xf32> to vector<128x128xf32>
    %147 = arith.mulf %30, %146 : vector<128x128xf32>
    %cst_64 = arith.constant dense<0.000000e+00> : vector<128xf32>
    %148 = vector.multi_reduction <add>, %147, %cst_64 [0] : vector<128x128xf32> to vector<128xf32>
    %149 = vector.shape_cast %148 : vector<128xf32> to vector<1x128xf32>
    %cst_65 = arith.constant dense<0.000000e+00> : vector<1xf32>
    %150 = vector.multi_reduction <add>, %149, %cst_65 [1] : vector<1x128xf32> to vector<1xf32>
    %151 = vector.shape_cast %150 : vector<1xf32> to vector<1x1xf32>
    %c8_i32 = arith.constant 8 : i32
    %152 = vector.broadcast %c8_i32 : i32 to vector<1x12xi32>
    %153 = arith.cmpi eq, %31, %152 : vector<1x12xi32>
    %cst_66 = arith.constant 0.000000e+00 : f32
    %154 = vector.shape_cast %151 : vector<1x1xf32> to vector<1x1xf32>
    %155 = vector.broadcast %154 : vector<1x1xf32> to vector<1x12xf32>
    %156 = vector.broadcast %cst_66 : f32 to vector<1x12xf32>
    %157 = arith.select %153, %155, %156 : vector<1x12xi1>, vector<1x12xf32>
    %158 = arith.addf %144, %157 : vector<1x12xf32>
    %c9 = arith.constant 9 : index
    %c0_67 = arith.constant 0 : index
    %c0_68 = arith.constant 0 : index
    %159 = vector.load %arg8[%c9, %c0_67, %c0_68] : memref<12x128x128xf32, #tpu.memory_space<vmem>>, vector<1x128x128xf32>
    %160 = vector.shape_cast %159 : vector<1x128x128xf32> to vector<128x128xf32>
    %161 = arith.mulf %30, %160 : vector<128x128xf32>
    %cst_69 = arith.constant dense<0.000000e+00> : vector<128xf32>
    %162 = vector.multi_reduction <add>, %161, %cst_69 [0] : vector<128x128xf32> to vector<128xf32>
    %163 = vector.shape_cast %162 : vector<128xf32> to vector<1x128xf32>
    %cst_70 = arith.constant dense<0.000000e+00> : vector<1xf32>
    %164 = vector.multi_reduction <add>, %163, %cst_70 [1] : vector<1x128xf32> to vector<1xf32>
    %165 = vector.shape_cast %164 : vector<1xf32> to vector<1x1xf32>
    %c9_i32 = arith.constant 9 : i32
    %166 = vector.broadcast %c9_i32 : i32 to vector<1x12xi32>
    %167 = arith.cmpi eq, %31, %166 : vector<1x12xi32>
    %cst_71 = arith.constant 0.000000e+00 : f32
    %168 = vector.shape_cast %165 : vector<1x1xf32> to vector<1x1xf32>
    %169 = vector.broadcast %168 : vector<1x1xf32> to vector<1x12xf32>
    %170 = vector.broadcast %cst_71 : f32 to vector<1x12xf32>
    %171 = arith.select %167, %169, %170 : vector<1x12xi1>, vector<1x12xf32>
    %172 = arith.addf %158, %171 : vector<1x12xf32>
    %c10 = arith.constant 10 : index
    %c0_72 = arith.constant 0 : index
    %c0_73 = arith.constant 0 : index
    %173 = vector.load %arg8[%c10, %c0_72, %c0_73] : memref<12x128x128xf32, #tpu.memory_space<vmem>>, vector<1x128x128xf32>
    %174 = vector.shape_cast %173 : vector<1x128x128xf32> to vector<128x128xf32>
    %175 = arith.mulf %30, %174 : vector<128x128xf32>
    %cst_74 = arith.constant dense<0.000000e+00> : vector<128xf32>
    %176 = vector.multi_reduction <add>, %175, %cst_74 [0] : vector<128x128xf32> to vector<128xf32>
    %177 = vector.shape_cast %176 : vector<128xf32> to vector<1x128xf32>
    %cst_75 = arith.constant dense<0.000000e+00> : vector<1xf32>
    %178 = vector.multi_reduction <add>, %177, %cst_75 [1] : vector<1x128xf32> to vector<1xf32>
    %179 = vector.shape_cast %178 : vector<1xf32> to vector<1x1xf32>
    %c10_i32 = arith.constant 10 : i32
    %180 = vector.broadcast %c10_i32 : i32 to vector<1x12xi32>
    %181 = arith.cmpi eq, %31, %180 : vector<1x12xi32>
    %cst_76 = arith.constant 0.000000e+00 : f32
    %182 = vector.shape_cast %179 : vector<1x1xf32> to vector<1x1xf32>
    %183 = vector.broadcast %182 : vector<1x1xf32> to vector<1x12xf32>
    %184 = vector.broadcast %cst_76 : f32 to vector<1x12xf32>
    %185 = arith.select %181, %183, %184 : vector<1x12xi1>, vector<1x12xf32>
    %186 = arith.addf %172, %185 : vector<1x12xf32>
    %c11 = arith.constant 11 : index
    %c0_77 = arith.constant 0 : index
    %c0_78 = arith.constant 0 : index
    %187 = vector.load %arg8[%c11, %c0_77, %c0_78] : memref<12x128x128xf32, #tpu.memory_space<vmem>>, vector<1x128x128xf32>
    %188 = vector.shape_cast %187 : vector<1x128x128xf32> to vector<128x128xf32>
    %189 = arith.mulf %30, %188 : vector<128x128xf32>
    %cst_79 = arith.constant dense<0.000000e+00> : vector<128xf32>
    %190 = vector.multi_reduction <add>, %189, %cst_79 [0] : vector<128x128xf32> to vector<128xf32>
    %191 = vector.shape_cast %190 : vector<128xf32> to vector<1x128xf32>
    %cst_80 = arith.constant dense<0.000000e+00> : vector<1xf32>
    %192 = vector.multi_reduction <add>, %191, %cst_80 [1] : vector<1x128xf32> to vector<1xf32>
    %193 = vector.shape_cast %192 : vector<1xf32> to vector<1x1xf32>
    %c11_i32 = arith.constant 11 : i32
    %194 = vector.broadcast %c11_i32 : i32 to vector<1x12xi32>
    %195 = arith.cmpi eq, %31, %194 : vector<1x12xi32>
    %cst_81 = arith.constant 0.000000e+00 : f32
    %196 = vector.shape_cast %193 : vector<1x1xf32> to vector<1x1xf32>
    %197 = vector.broadcast %196 : vector<1x1xf32> to vector<1x12xf32>
    %198 = vector.broadcast %cst_81 : f32 to vector<1x12xf32>
    %199 = arith.select %195, %197, %198 : vector<1x12xi1>, vector<1x12xf32>
    %200 = arith.addf %186, %199 : vector<1x12xf32>
    %c0_82 = arith.constant 0 : index
    %c0_83 = arith.constant 0 : index
    %c0_84 = arith.constant 0 : index
    %201 = vector.load %arg10[%c0_82, %c0_83, %c0_84] : memref<1x1x12xf32, #tpu.memory_space<vmem>>, vector<1x1x12xf32>
    %202 = vector.shape_cast %201 : vector<1x1x12xf32> to vector<1x12xf32>
    %203 = vector.shape_cast %200 : vector<1x12xf32> to vector<1x1x12xf32>
    tpu.vector_store %arg10[%c0_82, %c0_83, %c0_84], %203 {strides = array<i32>} : memref<1x1x12xf32, #tpu.memory_space<vmem>>, vector<1x1x12xf32>,
    return
  }
  func.func @transform_0(%arg0: i32) -> (i32, i32, i32) {
    %c0_i32 = arith.constant 0 : i32
    %c0_i32_0 = arith.constant 0 : i32
    %c0_i32_1 = arith.constant 0 : i32
    return %arg0, %c0_i32, %c0_i32_0 : i32, i32, i32
  }
  func.func @transform_1(%arg0: i32) -> (i32, i32) {
    %c0_i32 = arith.constant 0 : i32
    %c0_i32_0 = arith.constant 0 : i32
    %c0_i32_1 = arith.constant 0 : i32
    return %c0_i32, %c0_i32_0 : i32, i32
  }
  func.func @transform_2(%arg0: i32) -> (i32, i32) {
    %c0_i32 = arith.constant 0 : i32
    %c0_i32_0 = arith.constant 0 : i32
    %c0_i32_1 = arith.constant 0 : i32
    return %c0_i32, %c0_i32_0 : i32, i32
  }
  func.func @transform_3(%arg0: i32) -> (i32, i32) {
    %c0_i32 = arith.constant 0 : i32
    %c0_i32_0 = arith.constant 0 : i32
    %c0_i32_1 = arith.constant 0 : i32
    return %c0_i32, %c0_i32_0 : i32, i32
  }
  func.func @transform_4(%arg0: i32) -> (i32, i32) {
    %c0_i32 = arith.constant 0 : i32
    %c0_i32_0 = arith.constant 0 : i32
    %c0_i32_1 = arith.constant 0 : i32
    return %c0_i32, %c0_i32_0 : i32, i32
  }
  func.func @transform_5(%arg0: i32) -> (i32, i32) {
    %c0_i32 = arith.constant 0 : i32
    %c0_i32_0 = arith.constant 0 : i32
    %c0_i32_1 = arith.constant 0 : i32
    return %c0_i32, %c0_i32_0 : i32, i32
  }
  func.func @transform_6(%arg0: i32) -> (i32, i32) {
    %c0_i32 = arith.constant 0 : i32
    %c0_i32_0 = arith.constant 0 : i32
    %c0_i32_1 = arith.constant 0 : i32
    return %c0_i32, %c0_i32_0 : i32, i32
  }
  func.func @transform_7(%arg0: i32) -> (i32, i32, i32) {
    %c0_i32 = arith.constant 0 : i32
    %c0_i32_0 = arith.constant 0 : i32
    %c0_i32_1 = arith.constant 0 : i32
    %c0_i32_2 = arith.constant 0 : i32
    return %c0_i32, %c0_i32_0, %c0_i32_1 : i32, i32, i32
  }
  func.func @transform_8(%arg0: i32) -> (i32, i32) {
    %c0_i32 = arith.constant 0 : i32
    %c0_i32_0 = arith.constant 0 : i32
    %c0_i32_1 = arith.constant 0 : i32
    return %c0_i32, %c0_i32_0 : i32, i32
  }
  func.func @transform_9(%arg0: i32) -> (i32, i32, i32) {
    %c0_i32 = arith.constant 0 : i32
    %c0_i32_0 = arith.constant 0 : i32
    %c0_i32_1 = arith.constant 0 : i32
    return %arg0, %c0_i32, %c0_i32_0 : i32, i32, i32
  }
}

</mosaic_0001>

<bundles_post_ra>
// kernel: tpu_custom_call.1
= control target key start
LH: loop header
LB: loop body
LE: loop exit
PB: predicated region body
PF: predicated region fallthrough
CT: control target
= control target key end

     0   :  { %s2701_s0 = inlined_call_operand.vmem [shape: f32[2,128,64], index: 0, kind: input, shape index: {}]   ;;  %s2702_s1 = inlined_call_operand.hbm [shape: f32[128,128], index: 1, kind: input, shape index: {}]   ;;  %s2703_s2 = inlined_call_operand.vmem [shape: f32[1,64], index: 2, kind: input, shape index: {}]   ;;  %s2704_s3 = inlined_call_operand.hbm [shape: f32[64,128], index: 3, kind: input, shape index: {}]   ;;  %s2705_s4 = inlined_call_operand.vmem [shape: f32[1,128], index: 4, kind: input, shape index: {}]   ;;  %s2706_s5 = inlined_call_operand.vmem [shape: f32[128,384], index: 5, kind: input, shape index: {}]   ;;  %s2707_s6 = inlined_call_operand.vmem [shape: f32[1,128], index: 6, kind: input, shape index: {}]   ;;  %s2708_s7 = inlined_call_operand.hbm [shape: f32[12,128,128], index: 7, kind: input, shape index: {}]   ;;  %s2709_s8 = inlined_call_operand.vmem [shape: f32[1,12], index: 8, kind: input, shape index: {}]   ;;  %s2710_s9 = inlined_call_operand.hbm [shape: f32[2,1,12], index: 9, kind: output, shape index: {}]  }
   0x1   :  { %2711 = sst [smem:[#allocation13_spill]] %s2702_s1 }
   0x2   :  { %2712 = sst [smem:[#allocation14_spill]] %s2704_s3 }
   0x3   :  { %14 = vsyncpa [#allocation3], 0 }
   0x4   :  { %15 = vsyncpa [#allocation6], 0 }
   0x5   :  { %16 = vsyncpa [#allocation4], 0 }
   0x6   :  { %18 = vsyncpa [#allocation4 + $0x1], 0  ;;  %s2105_s30 = smov 0   ;;  %s2107_s10 = smov 0  }
   0x7   :  { %s2109_s11 = smov 0   ;;  %s2111_s12 = smov 0  }
   0x8 LB: > { %s2126_s13 = sadd.s32 4294967295, %s2048_s12   ;;  %s1741_s14 = sadd.s32 4294967294, %s2048_s12   ;;  %s2048_s12 = sphi %s2111_s12, %s2724_s12   ;;  %s2044_s11 = sphi %s2109_s11, %s2723_s11   ;;  %s2040_s10 = sphi %s2107_s10, %s2722_s10   ;;  %s2036_s30 = sphi %s2105_s30, %s2721_s30  }
   0x9   : > { %s2130_s15 = sadd.s32 1, %s2048_s12   ;;  %s225_s16 = sadd.s32 1, %s2044_s11 }
   0xa   : > { %s222_s17 = ssub.s32 %s2048_s12, %s2130_s15  ;;  %p235_p0 = scmp.ne.s32.totalorder %s2044_s11, %s2040_s10 }
   0xb   : > { %p223_p1 = scmp.eq.s32.totalorder %s222_s17, 0  ;;  %p236_p2 = scmp.eq.s32.totalorder %s2126_s13, 1 }
   0xc   : > { %p241_p3 = scmp.ne.s32.totalorder %s2040_s10, %s2036_s30  ;;  %p242_p4 = scmp.eq.s32.totalorder %s1741_s14, 1 }
   0xd   : > { %s2141_s18 = scalar_select %p223_p1, %s2044_s11, %s225_s16  }
   0xe   : > { %p2143_p5 = por %p236_p2, %p235_p0  ;;  %p2147_p6 = por %p242_p4, %p241_p3 }
   0xf   : > { %2713 = sst [smem:[#allocation12_spill]] %s2141_s18  ;;  %p1742_p7 = scmp.ge.s32.totalorder %s2048_s12, 1 }
  0x10   : > { %p249_p8 = scmp.lt.s32.totalorder %s2048_s12, 3  ;;  %p1840_p9 = scmp.eq.s32.totalorder %s2126_s13, 0 }
  0x11   : > { %s2717_s3 = sld [smem:[#allocation14_spill]]  ;;  %s2050_s29 = smov [#allocation5]  }
  0x12   : > { %p2154_p10 = pnand %p1742_p7, %p249_p8  ;;  %s2718_s1 = sld [smem:[#allocation13_spill]] }
  0x13   : > { %s279_s14 = sshll.u32 %s2050_s29, 4  ;;  %s2051_s16 = smov 128   ;;  %s280_s14 = int_to_ptr.vmem [resolvable:$true] %s279_s14 }
  0x14   : > { %p1826_p11 = pneg %p2154_p10  ;;  %s2052_s17 = smov 8  }
  0x15   : > { %s2053_s22 = smov [#allocation2]  }
  0x16   : > { %p2168_p12 = pnand %p1840_p9, %p1826_p11  ;;  %s262_s23 = sshll.u32 %s2053_s22, 4  ;;  %s263_s23 = int_to_ptr.vmem [resolvable:$true] %s262_s23 }
  0x17   : > { %s277_s24 = sshll.u32 %s2717_s3, 4  ;;  %s2054_s3 = smov [#allocation7]   ;;  %s278_s24 = int_to_ptr.hbm [resolvable:$true] %s277_s24 }
  0x18   : > { %s260_s27 = sshll.u32 %s2718_s1, 4  ;;  %s300_s1 = sshll.u32 %s2708_s7, 4  ;;  %s261_s27 = int_to_ptr.hbm [resolvable:$true] %s260_s27  ;;  %s301_s1 = int_to_ptr.hbm [resolvable:$true] %s300_s1 }
  0x19   : > { %1832 = dma.hbm_to_vmem [thread:$0]  (!%p2168_p12), %s278_s24, 1024, %s280_s14, [#allocation6], %s2051_s16, %s2051_s16, %s2052_s17  }
  0x1a   : > { %1829 = dma.hbm_to_vmem [thread:$0]  (!%p2168_p12), %s261_s27, 2048, %s263_s23, [#allocation3], %s2051_s16, %s2051_s16, %s2052_s17  }
  0x1b   : > { %s302_s18 = sshll.u32 %s2054_s3, 4  ;;  %329 = sbr.rel (%p2154_p10) target bundleno = 777 (0x309), region = 56  ;;  %s303_s18 = int_to_ptr.vmem [resolvable:$true] %s302_s18 }
  0x1c   : > { %1835 = dma.hbm_to_vmem [thread:$0]  (!%p2168_p12), %s301_s1, 24576, %s303_s18, [#allocation6], %s2051_s16, %s2051_s16, %s2052_s17  }
  0x20   : > { %2023 = dma.done.wait (%p1840_p9), [#allocation3], 2048  }
  0x21   : > { %2025 = vsyncadd (%p1840_p9), [#allocation3], 4294965248 }
  0x22   : > { %2027 = dma.done.wait (%p1840_p9), [#allocation6], 25600  }
  0x23   : > { %2029 = vsyncadd (%p1840_p9), [#allocation6], 4294941696  ;;  %p375_p13 = scmp.lt.s32.totalorder %s2126_s13, 1  ;;  %v504_v6 = vld [vmem:[#allocation5 + $0x38] sm:$0xff]  ;;  %v503_v15 = vld [vmem:[#allocation5 + $0x30] sm:$0xff]  ;;  %vm509_vm0 = vcmask 523264   ;;  %s1651_s16 = scalar_lea.hbm %s2710_s9, %s2126_s13 }
  0x24   : > { %1772 = vmatpush.msra.mxu1 %v504_v6  ;;  %1773 = vmatpush.msra.mxu2 %v504_v6  ;;  %v380_v18 = vld [vmem:[#allocation2] sm:$0xff]  ;;  %v381_v19 = vld [vmem:[#allocation2 + $0x8] sm:$0xff]  ;;  %v382_v21 = vld [vmem:[#allocation2 + $0x10] sm:$0xff]  ;;  %s373_s28 = sand.u32 1, %s2040_s10   ;;  %s1655_s23 = sshll.u32 %s1651_s16, 4  ;;  %vm1640_vm13 = vcmask 90112   ;;  %s1656_s23 = int_to_ptr.hbm [resolvable:$true] %s1655_s23 }
  0x25   : > { %s376_s3 = scalar_select %p375_p13, %s2126_s13, 1  ;;  %1774 = vmatpush.msra.mxu3 %v504_v6  ;;  %v502_v20 = vld [vmem:[#allocation5 + $0x28] sm:$0xff]  ;;  %v383_v22 = vld [vmem:[#allocation2 + $0x18] sm:$0xff]  ;;  %v501_v23 = vld [vmem:[#allocation5 + $0x20] sm:$0xff] }
  0x26   : > { %1775 = vmatpush.msra.mxu1 %v503_v15  ;;  %1776 = vmatpush.msra.mxu2 %v503_v15  ;;  %v384_v24 = vld [vmem:[#allocation2 + $0x20] sm:$0xff]  ;;  %v385_v25 = vld [vmem:[#allocation2 + $0x28] sm:$0xff]  ;;  %v500_v26 = vld [vmem:[#allocation5 + $0x18] sm:$0xff]  ;;  %s374_s17 = scalar_lea.vmem [#allocation8], %s373_s28  ;;  %s1643_s25 = scalar_lea.sflag [#allocation4], %s373_s28 }
  0x27   : > { %s1771_s1 = sshll.u32 %s376_s3, 7  ;;  %1777 = vmatpush.msra.mxu3 %v503_v15  ;;  %v386_v27 = vld [vmem:[#allocation2 + $0x30] sm:$0xff]  ;;  %v387_v28 = vld [vmem:[#allocation2 + $0x38] sm:$0xff]  ;;  %v388_v30 = vld [vmem:[#allocation2 + $0x40] sm:$0xff]  ;;  %s1653_s22 = sshll.u32 %s374_s17, 4  ;;  %s1654_s22 = int_to_ptr.vmem [resolvable:$true] %s1653_s22 }
  0x28   : > { %s2196_s24 = scalar_lea.vmem %s2701_s0, %s1771_s1  ;;  %1778 = vmatpush.msra.mxu1 %v502_v20  ;;  %1779 = vmatpush.msra.mxu2 %v502_v20  ;;  %v499_v29 = vld [vmem:[#allocation5 + $0x10] sm:$0xff]  ;;  %v389_v31 = vld [vmem:[#allocation2 + $0x48] sm:$0xff]  ;;  %v391_v34 = vld [vmem:[#allocation2 + $0x58] sm:$0xff]  ;;  %s1992_s26 = sshra.s32 %s1656_s23, 4  ;;  %s1993_s26 = int_to_ptr.hbm [resolvable:$true] %s1992_s26 }
  0x29   : > { %v411_v0 = vld [vmem:[%s2196_s24 + $0x78] sm:$0xff]  ;;  %v410_v1 = vld [vmem:[%s2196_s24 + $0x70] sm:$0xff]  ;;  %v409_v2 = vld [vmem:[%s2196_s24 + $0x68] sm:$0xff]  ;;  %1780 = vmatpush.msra.mxu3 %v502_v20  ;;  %s1994_s13 = scalar_lea.hbm %s1993_s26, 1  ;;  %s1998_s18 = scalar_lea.hbm %s2710_s9, 2 }
  0x2a   : > { %416 = vmatpush.msra.mxu0 %v411_v0  ;;  %v408_v3 = vld [vmem:[%s2196_s24 + $0x60] sm:$0xff]  ;;  %v407_v4 = vld [vmem:[%s2196_s24 + $0x58] sm:$0xff]  ;;  %v406_v5 = vld [vmem:[%s2196_s24 + $0x50] sm:$0xff]  ;;  %1781 = vmatpush.msra.mxu1 %v501_v23  ;;  %p1995_p0 = scmp.ne.s32.totalorder %s1993_s26, %s1994_s13  ;;  %p1999_p3 = scmp.lt.s32.totalorder %s1993_s26, %s2710_s9 }
  0x2b   : > { %v405_v7 = vld [vmem:[%s2196_s24 + $0x48] sm:$0xff]  ;;  %v404_v8 = vld [vmem:[%s2196_s24 + $0x40] sm:$0xff]  ;;  %v403_v9 = vld [vmem:[%s2196_s24 + $0x38] sm:$0xff]  ;;  %1782 = vmatpush.msra.mxu2 %v501_v23  ;;  %1783 = vmatpush.msra.mxu3 %v501_v23  ;;  %p2000_p4 = scmp.lt.s32.totalorder %s1998_s18, %s1994_s13 }
  0x2c   : > { %417 = vmatpush.msra.mxu0 %v410_v1  ;;  %v402_v10 = vld [vmem:[%s2196_s24 + $0x30] sm:$0xff]  ;;  %v401_v11 = vld [vmem:[%s2196_s24 + $0x28] sm:$0xff]  ;;  %v400_v12 = vld [vmem:[%s2196_s24 + $0x20] sm:$0xff]  ;;  %1784 = vmatpush.msra.mxu1 %v500_v26  ;;  %p1996_p1 = pnand %p1995_p0, %p2143_p5 }
  0x2d   : > { %v399_v13 = vld [vmem:[%s2196_s24 + $0x18] sm:$0xff]  ;;  %v398_v14 = vld [vmem:[%s2196_s24 + $0x10] sm:$0xff]  ;;  %v397_v16 = vld [vmem:[%s2196_s24 + $0x8] sm:$0xff]  ;;  %1785 = vmatpush.msra.mxu2 %v500_v26  ;;  %1786 = vmatpush.msra.mxu3 %v500_v26  ;;  %p2001_p7 = por %p2000_p4, %p1999_p3 }
  0x2e   : > { %418 = vmatpush.msra.mxu0 %v409_v2  ;;  %v396_v17 = vld [vmem:[%s2196_s24] sm:$0xff]  ;;  %1787 = vmatpush.msra.mxu1 %v499_v29  ;;  %v498_v32 = vld [vmem:[#allocation5 + $0x8] sm:$0xff]  ;;  %v390_v33 = vld [vmem:[#allocation2 + $0x50] sm:$0xff]  ;;  %p1997_p2 = pneg %p1996_p1 }
  0x2f   : > { %1788 = vmatpush.msra.mxu2 %v499_v29  ;;  %1789 = vmatpush.msra.mxu3 %v499_v29  ;;  %v497_v35 = vld [vmem:[#allocation5] sm:$0xff]  ;;  %v393_v37 = vld [vmem:[#allocation2 + $0x68] sm:$0xff]  ;;  %v394_v38 = vld [vmem:[#allocation2 + $0x70] sm:$0xff] }
  0x30   : > { %419 = vmatpush.msra.mxu0 %v408_v3  ;;  %1790 = vmatpush.msra.mxu1 %v498_v32  ;;  %v392_v36 = vld [vmem:[#allocation2 + $0x60] sm:$0xff]  ;;  %v395_v39 = vld [vmem:[#allocation2 + $0x78] sm:$0xff]  ;;  %p2002_p8 = pnand %p2001_p7, %p1997_p2 }
  0x31   : > { %1791 = vmatpush.msra.mxu2 %v498_v32  ;;  %1792 = vmatpush.msra.mxu3 %v498_v32  ;;  %v2217_v40 = vld [vmem:[%s2703_s2] ss:$0 sm:$0xff] }
  0x32   : > { %420 = vmatpush.msra.mxu0 %v407_v4  ;;  %1793 = vmatpush.msra.mxu1 %v497_v35  ;;  %v684_v4 = vld [vmem:[%s2706_s5 + $0x168] sm:$0xff] }
  0x33   : > { %1794 = vmatpush.msra.mxu2 %v497_v35  ;;  %1795 = vmatpush.msra.mxu3 %v497_v35 }
  0x34   : > { %421 = vmatpush.msra.mxu0 %v406_v5  ;;  %v685_v5 = vld [vmem:[%s2706_s5 + $0x170] sm:$0xff] }
  0x35   : > { %687 = vmatpush.msrb.mxu2 %v684_v4  ;;  %750 = vmatpush.msrb.mxu3 %v685_v5 }
  0x36   : > { %422 = vmatpush.msra.mxu0 %v405_v7 }
  0x38   : > { %423 = vmatpush.msra.mxu0 %v404_v8 }
  0x3a   : > { %424 = vmatpush.msra.mxu0 %v403_v9  ;;  %v681_v9 = vld [vmem:[%s2706_s5 + $0x150] sm:$0xff] }
  0x3b   : > { %688 = vmatpush.msrb.mxu2 %v681_v9 }
  0x3c   : > { %425 = vmatpush.msra.mxu0 %v402_v10  ;;  %v682_v10 = vld [vmem:[%s2706_s5 + $0x158] sm:$0xff] }
  0x3d   : > { %751 = vmatpush.msrb.mxu3 %v682_v10  ;;  %v2438_v10 = vld [vmem:[%s2705_s4] ss:$0 sm:$0xff] }
  0x3e   : > { %426 = vmatpush.msra.mxu0 %v401_v11  ;;  %v2259_v11 = vld [vmem:[%s2706_s5 + $0x160] sm:$0xff] }
  0x40   : > { %427 = vmatpush.msra.mxu0 %v400_v12 }
  0x42   : > { %428 = vmatpush.msra.mxu0 %v399_v13  ;;  %v678_v13 = vld [vmem:[%s2706_s5 + $0x138] sm:$0xff] }
  0x43   : > { %689 = vmatpush.msrb.mxu2 %v678_v13 }
  0x44   : > { %429 = vmatpush.msra.mxu0 %v398_v14  ;;  %v679_v14 = vld [vmem:[%s2706_s5 + $0x140] sm:$0xff] }
  0x45   : > { %752 = vmatpush.msrb.mxu3 %v679_v14 }
  0x46   : > { %430 = vmatpush.msra.mxu0 %v397_v16  ;;  %v675_v16 = vld [vmem:[%s2706_s5 + $0x120] sm:$0xff] }
  0x47   : > { %690 = vmatpush.msrb.mxu2 %v675_v16 }
  0x48   : > { %431 = vmatpush.msra.mxu0 %v396_v17  ;;  %v676_v17 = vld [vmem:[%s2706_s5 + $0x128] sm:$0xff] }
  0x49   : > { %432 = vmatmul.f32.vlgmr.msra.gmra.mxu0 %v380_v18  ;;  %v2284_v18 = vld [vmem:[%s2706_s5 + $0x130] sm:$0xff]  ;;  %753 = vmatpush.msrb.mxu3 %v676_v17 }
  0x4a   : > { %566 = vmatpush.msrb.mxu0 %v504_v6  ;;  %v2246_v6 = vld [vmem:[%s2706_s5 + $0x178] sm:$0xff] }
  0x4b   : > { %815 = vmatpush.msrb.mxu1 %v2246_v6 }
  0x4c   : > { %567 = vmatpush.msrb.mxu0 %v503_v15  ;;  %v2271_v15 = vld [vmem:[%s2706_s5 + $0x148] sm:$0xff] }
  0x4d   : > { %816 = vmatpush.msrb.mxu1 %v2259_v11 }
  0x4e   : > { %568 = vmatpush.msrb.mxu0 %v502_v20  ;;  %v673_v20 = vld [vmem:[%s2706_s5 + $0x110] sm:$0xff] }
  0x4f   : > { %817 = vmatpush.msrb.mxu1 %v2271_v15  ;;  %754 = vmatpush.msrb.mxu3 %v673_v20 }
  0x50   : > { %569 = vmatpush.msrb.mxu0 %v501_v23 }
  0x51   : > { %435 = vmatmul.f32.gmra.mxu0 %v381_v19  ;;  %818 = vmatpush.msrb.mxu1 %v2284_v18  ;;  %v672_v19 = vld [vmem:[%s2706_s5 + $0x108] sm:$0xff] }
  0x52   : > { %570 = vmatpush.msrb.mxu0 %v500_v26  ;;  %691 = vmatpush.msrb.mxu2 %v672_v19  ;;  %v2309_v26 = vld [vmem:[%s2706_s5 + $0x100] sm:$0xff] }
  0x54   : > { %571 = vmatpush.msrb.mxu0 %v499_v29  ;;  %v667_v29 = vld [vmem:[%s2706_s5 + $0xe0] sm:$0xff] }
  0x56   : > { %572 = vmatpush.msrb.mxu0 %v498_v32  ;;  %v664_v32 = vld [vmem:[%s2706_s5 + $0xc8] sm:$0xff] }
  0x58   : > { %573 = vmatpush.msrb.mxu0 %v497_v35  ;;  %v661_v35 = vld [vmem:[%s2706_s5 + $0xb0] sm:$0xff] }
  0x59   : > { %438 = vmatmul.f32.gmra.mxu0 %v382_v21  ;;  %v2296_v21 = vld [vmem:[%s2706_s5 + $0x118] sm:$0xff] }
  0x5a   : > { %819 = vmatpush.msrb.mxu1 %v2296_v21 }
  0x5c   : > { %820 = vmatpush.msrb.mxu1 %v2309_v26 }
  0x61   : > { %441 = vmatmul.f32.gmra.mxu0 %v383_v22 }
  0x69   : > { %444 = vmatmul.f32.gmra.mxu0 %v384_v24  ;;  %v669_v24 = vld [vmem:[%s2706_s5 + $0xf0] sm:$0xff] }
  0x6a   : > { %692 = vmatpush.msrb.mxu2 %v669_v24 }
  0x71   : > { %447 = vmatmul.f32.gmra.mxu0 %v385_v25  ;;  %v670_v25 = vld [vmem:[%s2706_s5 + $0xf8] sm:$0xff] }
  0x72   : > { %755 = vmatpush.msrb.mxu3 %v670_v25 }
  0x74   : > { %756 = vmatpush.msrb.mxu3 %v667_v29 }
  0x76   : > { %757 = vmatpush.msrb.mxu3 %v664_v32 }
  0x78   : > { %758 = vmatpush.msrb.mxu3 %v661_v35 }
  0x79   : > { %450 = vmatmul.f32.gmra.mxu0 %v386_v27 }
  0x81   : > { %453 = vmatmul.f32.gmra.mxu0 %v387_v28  ;;  %v666_v28 = vld [vmem:[%s2706_s5 + $0xd8] sm:$0xff] }
  0x82   : > { %693 = vmatpush.msrb.mxu2 %v666_v28 }
  0x89   : > { %456 = vmatmul.f32.gmra.mxu0 %v388_v30  ;;  %v2321_v30 = vld [vmem:[%s2706_s5 + $0xe8] sm:$0xff] }
  0x8a   : > { %821 = vmatpush.msrb.mxu1 %v2321_v30 }
  0x91   : > { %459 = vmatmul.f32.gmra.mxu0 %v389_v31  ;;  %v663_v31 = vld [vmem:[%s2706_s5 + $0xc0] sm:$0xff] }
  0x92   : > { %694 = vmatpush.msrb.mxu2 %v663_v31 }
  0x99   : > { %462 = vmatmul.f32.gmra.mxu0 %v390_v33  ;;  %v2334_v33 = vld [vmem:[%s2706_s5 + $0xd0] sm:$0xff] }
  0x9a   : > { %822 = vmatpush.msrb.mxu1 %v2334_v33 }
  0xa1   : > { %465 = vmatmul.f32.gmra.mxu0 %v391_v34  ;;  %v660_v34 = vld [vmem:[%s2706_s5 + $0xa8] sm:$0xff] }
  0xa2   : > { %695 = vmatpush.msrb.mxu2 %v660_v34 }
  0xa9   : > { %468 = vmatmul.f32.gmra.mxu0 %v392_v36  ;;  %v2346_v36 = vld [vmem:[%s2706_s5 + $0xb8] sm:$0xff] }
  0xaa   : > { %823 = vmatpush.msrb.mxu1 %v2346_v36 }
  0xb1   : > { %471 = vmatmul.f32.gmra.mxu0 %v393_v37 }
  0xb9   : > { %474 = vmatmul.f32.gmra.mxu0 %v394_v38 }
  0xc1   : > { %477 = vmatmul.f32.gmra.mxu0 %v395_v39  ;;  %v657_v39 = vld [vmem:[%s2706_s5 + $0x90] sm:$0xff] }
  0xc2   : > { %696 = vmatpush.msrb.mxu2 %v657_v39 }
  0xc6   : > { %v433_v41 = vpop.f32.mrf.mxu0 }
  0xc7   : > { %v434_v42 = vadd.f32 %v2217_v40, %v433_v41  ;;  %v658_v41 = vld [vmem:[%s2706_s5 + $0x98] sm:$0xff] }
  0xc8   : > { %759 = vmatpush.msrb.mxu3 %v658_v41 }
  0xc9   : > { %v481_v43 = vmax.f32 %v434_v42, 0.0  ;;  %v2359_v42 = vld [vmem:[%s2706_s5 + $0xa0] sm:$0xff] }
  0xca   : > { %824 = vmatpush.msrb.mxu1 %v2359_v42 }
  0xcb   : > { %1753 = vmatmul.msk.f32.vlgmr.msrb.gmra.mxu0 %vm509_vm0, %v481_v43 }
  0xce   : > { %v436_v44 = vpop.f32.mrf.mxu0 }
  0xcf   : > { %v437_v45 = vadd.f32 %v2217_v40, %v436_v44  ;;  %v654_v44 = vld [vmem:[%s2706_s5 + $0x78] sm:$0xff] }
  0xd0   : > { %697 = vmatpush.msrb.mxu2 %v654_v44 }
  0xd1   : > { %v482_v46 = vmax.f32 %v437_v45, 0.0  ;;  %v655_v45 = vld [vmem:[%s2706_s5 + $0x80] sm:$0xff] }
  0xd2   : > { %760 = vmatpush.msrb.mxu3 %v655_v45 }
  0xd3   : > { %1754 = vmatmul.msk.f32.gmra.mxu0 %vm509_vm0, %v482_v46  ;;  %v656_v46 = vld [vmem:[%s2706_s5 + $0x88] sm:$0xff] }
  0xd4   : > { %825 = vmatpush.msrb.mxu1 %v656_v46 }
  0xd6   : > { %v439_v47 = vpop.f32.mrf.mxu0 }
  0xd7   : > { %v440_v48 = vadd.f32 %v2217_v40, %v439_v47  ;;  %v651_v47 = vld [vmem:[%s2706_s5 + $0x60] sm:$0xff] }
  0xd8   : > { %698 = vmatpush.msrb.mxu2 %v651_v47 }
  0xd9   : > { %v483_v49 = vmax.f32 %v440_v48, 0.0  ;;  %v652_v48 = vld [vmem:[%s2706_s5 + $0x68] sm:$0xff] }
  0xda   : > { %761 = vmatpush.msrb.mxu3 %v652_v48 }
  0xdb   : > { %1755 = vmatmul.msk.f32.gmra.mxu0 %vm509_vm0, %v483_v49  ;;  %v653_v49 = vld [vmem:[%s2706_s5 + $0x70] sm:$0xff] }
  0xdc   : > { %826 = vmatpush.msrb.mxu1 %v653_v49 }
  0xde   : > { %v442_v50 = vpop.f32.mrf.mxu0 }
  0xdf   : > { %v443_v51 = vadd.f32 %v2217_v40, %v442_v50  ;;  %v648_v50 = vld [vmem:[%s2706_s5 + $0x48] sm:$0xff] }
  0xe0   : > { %699 = vmatpush.msrb.mxu2 %v648_v50 }
  0xe1   : > { %v484_v52 = vmax.f32 %v443_v51, 0.0  ;;  %v649_v51 = vld [vmem:[%s2706_s5 + $0x50] sm:$0xff] }
  0xe2   : > { %762 = vmatpush.msrb.mxu3 %v649_v51 }
  0xe3   : > { %1756 = vmatmul.msk.f32.vlgmr.msra.gmra.mxu1 %vm509_vm0, %v484_v52  ;;  %v650_v52 = vld [vmem:[%s2706_s5 + $0x58] sm:$0xff] }
  0xe4   : > { %827 = vmatpush.msrb.mxu1 %v650_v52 }
  0xe6   : > { %v445_v53 = vpop.f32.mrf.mxu0 }
  0xe7   : > { %v446_v54 = vadd.f32 %v2217_v40, %v445_v53 }
  0xe9   : > { %v485_v55 = vmax.f32 %v446_v54, 0.0 }
  0xeb   : > { %1757 = vmatmul.msk.f32.gmra.mxu1 %vm509_vm0, %v485_v55  ;;  %v645_v55 = vld [vmem:[%s2706_s5 + $0x30] sm:$0xff] }
  0xec   : > { %700 = vmatpush.msrb.mxu2 %v645_v55 }
  0xee   : > { %v448_v56 = vpop.f32.mrf.mxu0 }
  0xef   : > { %v449_v57 = vadd.f32 %v2217_v40, %v448_v56  ;;  %v646_v56 = vld [vmem:[%s2706_s5 + $0x38] sm:$0xff] }
  0xf0   : > { %763 = vmatpush.msrb.mxu3 %v646_v56 }
  0xf1   : > { %v486_v58 = vmax.f32 %v449_v57, 0.0  ;;  %v647_v57 = vld [vmem:[%s2706_s5 + $0x40] sm:$0xff] }
  0xf2   : > { %828 = vmatpush.msrb.mxu1 %v647_v57 }
  0xf3   : > { %1758 = vmatmul.msk.f32.gmra.mxu1 %vm509_vm0, %v486_v58 }
  0xf6   : > { %v451_v59 = vpop.f32.mrf.mxu0 }
  0xf7   : > { %v452_v60 = vadd.f32 %v2217_v40, %v451_v59  ;;  %v642_v59 = vld [vmem:[%s2706_s5 + $0x18] sm:$0xff] }
  0xf8   : > { %701 = vmatpush.msrb.mxu2 %v642_v59 }
  0xf9   : > { %v487_v61 = vmax.f32 %v452_v60, 0.0  ;;  %v643_v60 = vld [vmem:[%s2706_s5 + $0x20] sm:$0xff] }
  0xfa   : > { %764 = vmatpush.msrb.mxu3 %v643_v60 }
  0xfb   : > { %1759 = vmatmul.msk.f32.gmra.mxu1 %vm509_vm0, %v487_v61  ;;  %v644_v61 = vld [vmem:[%s2706_s5 + $0x28] sm:$0xff] }
  0xfc   : > { %829 = vmatpush.msrb.mxu1 %v644_v61 }
  0xfe   : > { %v454_v62 = vpop.f32.mrf.mxu0 }
  0xff   : > { %v455_v63 = vadd.f32 %v2217_v40, %v454_v62  ;;  %v639_v62 = vld [vmem:[%s2706_s5] sm:$0xff] }
 0x100   : > { %702 = vmatpush.msrb.mxu2 %v639_v62 }
 0x101   : > { %v488_v0 = vmax.f32 %v455_v63, 0.0  ;;  %v640_v63 = vld [vmem:[%s2706_s5 + $0x8] sm:$0xff] }
 0x102   : > { %765 = vmatpush.msrb.mxu3 %v640_v63 }
 0x103   : > { %1760 = vmatmul.msk.f32.gmra.mxu1 %vm509_vm0, %v488_v0  ;;  %v641_v0 = vld [vmem:[%s2706_s5 + $0x10] sm:$0xff] }
 0x104   : > { %830 = vmatpush.msrb.mxu1 %v641_v0 }
 0x106   : > { %v457_v1 = vpop.f32.mrf.mxu0 }
 0x107   : > { %v458_v2 = vadd.f32 %v2217_v40, %v457_v1 }
 0x109   : > { %v489_v3 = vmax.f32 %v458_v2, 0.0 }
 0x10b   : > { %1761 = vmatmul.msk.f32.gmra.mxu1 %vm509_vm0, %v489_v3 }
 0x10e   : > { %v460_v7 = vpop.f32.mrf.mxu0 }
 0x10f   : > { %v461_v8 = vadd.f32 %v2217_v40, %v460_v7 }
 0x111   : > { %v490_v12 = vmax.f32 %v461_v8, 0.0 }
 0x113   : > { %1762 = vmatmul.msk.f32.vlgmr.msra.gmra.mxu2 %vm509_vm0, %v490_v12 }
 0x114   : > { %1796 = vmatpush.msra.mxu2 %v2246_v6 }
 0x116   : > { %v463_v22 = vpop.f32.mrf.mxu0  ;;  %1797 = vmatpush.msra.mxu2 %v2259_v11 }
 0x117   : > { %v464_v23 = vadd.f32 %v2217_v40, %v463_v22 }
 0x118   : > { %1798 = vmatpush.msra.mxu2 %v2271_v15 }
 0x119   : > { %v491_v27 = vmax.f32 %v464_v23, 0.0 }
 0x11a   : > { %1799 = vmatpush.msra.mxu2 %v2284_v18 }
 0x11b   : > { %1763 = vmatmul.msk.f32.gmra.mxu2 %vm509_vm0, %v491_v27 }
 0x11c   : > { %1800 = vmatpush.msra.mxu2 %v2296_v21 }
 0x11e   : > { %v466_v37 = vpop.f32.mrf.mxu0  ;;  %1801 = vmatpush.msra.mxu2 %v2309_v26 }
 0x11f   : > { %v467_v38 = vadd.f32 %v2217_v40, %v466_v37 }
 0x120   : > { %1802 = vmatpush.msra.mxu2 %v2321_v30 }
 0x121   : > { %v492_v43 = vmax.f32 %v467_v38, 0.0 }
 0x122   : > { %1803 = vmatpush.msra.mxu2 %v2334_v33 }
 0x123   : > { %1764 = vmatmul.msk.f32.gmra.mxu2 %vm509_vm0, %v492_v43 }
 0x124   : > { %1804 = vmatpush.msra.mxu2 %v2346_v36 }
 0x126   : > { %v469_v53 = vpop.f32.mrf.mxu0  ;;  %1805 = vmatpush.msra.mxu2 %v2359_v42 }
 0x127   : > { %v470_v54 = vadd.f32 %v2217_v40, %v469_v53 }
 0x128   : > { %1806 = vmatpush.msra.mxu2 %v656_v46 }
 0x129   : > { %v493_v58 = vmax.f32 %v470_v54, 0.0 }
 0x12a   : > { %1807 = vmatpush.msra.mxu2 %v653_v49 }
 0x12b   : > { %1765 = vmatmul.msk.f32.gmra.mxu2 %vm509_vm0, %v493_v58 }
 0x12c   : > { %1808 = vmatpush.msra.mxu2 %v650_v52 }
 0x12e   : > { %v472_v1 = vpop.f32.mrf.mxu0  ;;  %1809 = vmatpush.msra.mxu2 %v647_v57 }
 0x12f   : > { %v473_v2 = vadd.f32 %v2217_v40, %v472_v1 }
 0x130   : > { %1810 = vmatpush.msra.mxu2 %v644_v61 }
 0x131   : > { %v494_v3 = vmax.f32 %v473_v2, 0.0 }
 0x132   : > { %1811 = vmatpush.msra.mxu2 %v641_v0 }
 0x133   : > { %1766 = vmatmul.msk.f32.vlgmr.msra.gmra.mxu3 %vm509_vm0, %v494_v3  ;;  %v2459_v3 = vld [vmem:[%s2707_s6] ss:$0 sm:$0xff] }
 0x136   : > { %v475_v4 = vpop.f32.mrf.mxu0 }
 0x137   : > { %v476_v5 = vadd.f32 %v2217_v40, %v475_v4 }
 0x139   : > { %v495_v6 = vmax.f32 %v476_v5, 0.0 }
 0x13b   : > { %1767 = vmatmul.msk.f32.gmra.mxu3 %vm509_vm0, %v495_v6 }
 0x13e   : > { %v478_v7 = vpop.f32.mrf.mxu0 }
 0x13f   : > { %v479_v8 = vadd.f32 %v2217_v40, %v478_v7 }
 0x141   : > { %v496_v9 = vmax.f32 %v479_v8, 0.0  ;;  %v1169_v8 = vld [vmem:[#allocation7 + $0x200] sm:$0xff] }
 0x143   : > { %1768 = vmatmul.msk.f32.gmra.mxu3 %vm509_vm0, %v496_v9  ;;  %v1051_v9 = vld [vmem:[#allocation7 + $0x100] sm:$0xff] }
 0x148   : > { %v575_v11 = vpop.f32.mrf.mxu0 }
 0x149   : > { %v576_v12 = vadd.f32 %v2438_v10, %v575_v11  ;;  %v1228_v11 = vld [vmem:[#allocation7 + $0x280] sm:$0xff] }
 0x14b   : > { %v623_v13 = vmax.f32 %v576_v12, 0.0  ;;  %v1110_v12 = vld [vmem:[#allocation7 + $0x180] sm:$0xff] }
 0x14d   : > { %703 = vmatmul.f32.vlgmr.msrb.gmra.mxu2 %v623_v13  ;;  %766 = vmatmul.f32.vlgmr.msrb.gmra.mxu3 %v623_v13 }
 0x14e   : > { %831 = vmatmul.f32.vlgmr.msrb.gmra.mxu1 %v623_v13  ;;  %v992_v13 = vld [vmem:[#allocation7 + $0x80] sm:$0xff] }
 0x150   : > { %v578_v40 = vpop.f32.mrf.mxu0 }
 0x151   : > { %v579_v14 = vadd.f32 %v2438_v10, %v578_v40 }
 0x153   : > { %v624_v15 = vmax.f32 %v579_v14, 0.0  ;;  %v1405_v14 = vld [vmem:[#allocation7 + $0x400] sm:$0xff] }
 0x155   : > { %706 = vmatmul.f32.gmra.mxu2 %v624_v15  ;;  %769 = vmatmul.f32.gmra.mxu3 %v624_v15 }
 0x156   : > { %833 = vmatmul.f32.gmra.mxu1 %v624_v15  ;;  %v1346_v15 = vld [vmem:[#allocation7 + $0x380] sm:$0xff] }
 0x158   : > { %v581_v16 = vpop.f32.mrf.mxu0 }
 0x159   : > { %v582_v17 = vadd.f32 %v2438_v10, %v581_v16  ;;  %v1287_v16 = vld [vmem:[#allocation7 + $0x300] sm:$0xff] }
 0x15b   : > { %v625_v18 = vmax.f32 %v582_v17, 0.0 }
 0x15d   : > { %709 = vmatmul.f32.gmra.mxu2 %v625_v18  ;;  %772 = vmatmul.f32.gmra.mxu3 %v625_v18 }
 0x15e   : > { %835 = vmatmul.f32.gmra.mxu1 %v625_v18  ;;  %v1170_v18 = vld [vmem:[#allocation7 + $0x208] sm:$0xff] }
 0x160   : > { %v584_v19 = vpop.f32.mrf.mxu1 }
 0x161   : > { %v585_v20 = vadd.f32 %v2438_v10, %v584_v19  ;;  %v1582_v19 = vld [vmem:[#allocation7 + $0x580] sm:$0xff] }
 0x163   : > { %v626_v21 = vmax.f32 %v585_v20, 0.0  ;;  %v1523_v20 = vld [vmem:[#allocation7 + $0x500] sm:$0xff] }
 0x165   : > { %712 = vmatmul.f32.gmra.mxu2 %v626_v21  ;;  %775 = vmatmul.f32.gmra.mxu3 %v626_v21 }
 0x166   : > { %838 = vmatmul.f32.gmra.mxu1 %v626_v21 }
 0x168   : > { %v587_v22 = vpop.f32.mrf.mxu1 }
 0x169   : > { %v588_v23 = vadd.f32 %v2438_v10, %v587_v22  ;;  %v1052_v22 = vld [vmem:[#allocation7 + $0x108] sm:$0xff] }
 0x16b   : > { %v627_v24 = vmax.f32 %v588_v23, 0.0 }
 0x16d   : > { %715 = vmatmul.f32.gmra.mxu2 %v627_v24  ;;  %778 = vmatmul.f32.gmra.mxu3 %v627_v24 }
 0x16e   : > { %841 = vmatmul.f32.gmra.mxu1 %v627_v24  ;;  %v934_v24 = vld [vmem:[#allocation7 + $0x8] sm:$0xff] }
 0x170   : > { %v590_v25 = vpop.f32.mrf.mxu1 }
 0x171   : > { %v591_v26 = vadd.f32 %v2438_v10, %v590_v25 }
 0x173   : > { %v628_v27 = vmax.f32 %v591_v26, 0.0  ;;  %v1229_v26 = vld [vmem:[#allocation7 + $0x288] sm:$0xff] }
 0x175   : > { %718 = vmatmul.f32.gmra.mxu2 %v628_v27  ;;  %781 = vmatmul.f32.gmra.mxu3 %v628_v27 }
 0x176   : > { %844 = vmatmul.f32.gmra.mxu1 %v628_v27 }
 0x178   : > { %v593_v28 = vpop.f32.mrf.mxu1 }
 0x179   : > { %v594_v29 = vadd.f32 %v2438_v10, %v593_v28 }
 0x17b   : > { %v629_v30 = vmax.f32 %v594_v29, 0.0  ;;  %v1111_v29 = vld [vmem:[#allocation7 + $0x188] sm:$0xff] }
 0x17d   : > { %721 = vmatmul.f32.gmra.mxu2 %v629_v30  ;;  %784 = vmatmul.f32.gmra.mxu3 %v629_v30 }
 0x17e   : > { %847 = vmatmul.f32.gmra.mxu1 %v629_v30 }
 0x180   : > { %v596_v31 = vpop.f32.mrf.mxu1 }
 0x181   : > { %v597_v32 = vadd.f32 %v2438_v10, %v596_v31  ;;  %v993_v31 = vld [vmem:[#allocation7 + $0x88] sm:$0xff] }
 0x183   : > { %v630_v33 = vmax.f32 %v597_v32, 0.0 }
 0x185   : > { %724 = vmatmul.f32.gmra.mxu2 %v630_v33  ;;  %787 = vmatmul.f32.gmra.mxu3 %v630_v33 }
 0x186   : > { %850 = vmatmul.f32.gmra.mxu1 %v630_v33  ;;  %v1406_v33 = vld [vmem:[#allocation7 + $0x408] sm:$0xff] }
 0x188   : > { %v599_v34 = vpop.f32.mrf.mxu1 }
 0x189   : > { %v600_v35 = vadd.f32 %v2438_v10, %v599_v34 }
 0x18b   : > { %v631_v36 = vmax.f32 %v600_v35, 0.0 }
 0x18d   : > { %727 = vmatmul.f32.gmra.mxu2 %v631_v36  ;;  %790 = vmatmul.f32.gmra.mxu3 %v631_v36 }
 0x18e   : > { %853 = vmatmul.f32.gmra.mxu1 %v631_v36 }
 0x196   : > { %v602_v37 = vpop.f32.mrf.mxu2 }
 0x197   : > { %v603_v38 = vadd.f32 %v2438_v10, %v602_v37 }
 0x199   : > { %v632_v39 = vmax.f32 %v603_v38, 0.0 }
 0x19b   : > { %730 = vmatmul.f32.gmra.mxu2 %v632_v39  ;;  %793 = vmatmul.f32.gmra.mxu3 %v632_v39 }
 0x19c   : > { %856 = vmatmul.f32.gmra.mxu1 %v632_v39 }
 0x19e   : > { %v605_v41 = vpop.f32.mrf.mxu2 }
 0x19f   : > { %v606_v42 = vadd.f32 %v2438_v10, %v605_v41 }
 0x1a1   : > { %v633_v43 = vmax.f32 %v606_v42, 0.0 }
 0x1a3   : > { %733 = vmatmul.f32.gmra.mxu2 %v633_v43  ;;  %796 = vmatmul.f32.gmra.mxu3 %v633_v43 }
 0x1a4   : > { %859 = vmatmul.f32.gmra.mxu1 %v633_v43 }
 0x1a6   : > { %v608_v44 = vpop.f32.mrf.mxu2 }
 0x1a7   : > { %v609_v45 = vadd.f32 %v2438_v10, %v608_v44 }
 0x1a9   : > { %v634_v46 = vmax.f32 %v609_v45, 0.0 }
 0x1ab   : > { %736 = vmatmul.f32.gmra.mxu2 %v634_v46  ;;  %799 = vmatmul.f32.gmra.mxu3 %v634_v46 }
 0x1ac   : > { %862 = vmatmul.f32.gmra.mxu1 %v634_v46  ;;  %v1347_v46 = vld [vmem:[#allocation7 + $0x388] sm:$0xff] }
 0x1ae   : > { %v611_v47 = vpop.f32.mrf.mxu2 }
 0x1af   : > { %v612_v48 = vadd.f32 %v2438_v10, %v611_v47 }
 0x1b1   : > { %v635_v49 = vmax.f32 %v612_v48, 0.0 }
 0x1b3   : > { %739 = vmatmul.f32.gmra.mxu2 %v635_v49  ;;  %802 = vmatmul.f32.gmra.mxu3 %v635_v49 }
 0x1b4   : > { %865 = vmatmul.f32.gmra.mxu1 %v635_v49 }
 0x1b6   : > { %v614_v50 = vpop.f32.mrf.mxu3 }
 0x1b7   : > { %v615_v51 = vadd.f32 %v2438_v10, %v614_v50 }
 0x1b9   : > { %v636_v52 = vmax.f32 %v615_v51, 0.0  ;;  %v1288_v51 = vld [vmem:[#allocation7 + $0x308] sm:$0xff] }
 0x1bb   : > { %742 = vmatmul.f32.gmra.mxu2 %v636_v52  ;;  %805 = vmatmul.f32.gmra.mxu3 %v636_v52 }
 0x1bc   : > { %868 = vmatmul.f32.gmra.mxu1 %v636_v52  ;;  %v1583_v52 = vld [vmem:[#allocation7 + $0x588] sm:$0xff] }
 0x1be   : > { %v617_v53 = vpop.f32.mrf.mxu3 }
 0x1bf   : > { %v618_v54 = vadd.f32 %v2438_v10, %v617_v53  ;;  %v1524_v53 = vld [vmem:[#allocation7 + $0x508] sm:$0xff] }
 0x1c1   : > { %v637_v55 = vmax.f32 %v618_v54, 0.0 }
 0x1c3   : > { %745 = vmatmul.f32.gmra.mxu2 %v637_v55  ;;  %808 = vmatmul.f32.gmra.mxu3 %v637_v55 }
 0x1c4   : > { %871 = vmatmul.f32.gmra.mxu1 %v637_v55 }
 0x1c6   : > { %v620_v56 = vpop.f32.mrf.mxu3 }
 0x1c7   : > { %v621_v57 = vadd.f32 %v2438_v10, %v620_v56  ;;  %v933_v10 = vld [vmem:[#allocation7] sm:$0xff] }
 0x1c9   : > { %v638_v58 = vmax.f32 %v621_v57, 0.0 }
 0x1cb   : > { %v832_v59 = vpop.f32.mrf.mxu1  ;;  %747 = vmatmul.f32.gmra.mxu2 %v638_v58  ;;  %811 = vmatmul.f32.gmra.mxu3 %v638_v58 }
 0x1cc   : > { %v1465_v59 = vld [vmem:[#allocation7 + $0x488] sm:$0xff] }
 0x1d0   : > { %v704_v60 = vpop.f32.mrf.mxu2  ;;  %v767_v61 = vpop.f32.mrf.mxu3 }
 0x1d3   : > { %v834_v62 = vpop.f32.mrf.mxu1  ;;  %874 = vmatmul.f32.vlgmr.msra.gmra.mxu2 %v638_v58  ;;  %v1464_v58 = vld [vmem:[#allocation7 + $0x480] sm:$0xff] }
 0x1d8   : > { %v707_v63 = vpop.f32.mrf.mxu2  ;;  %v770_v0 = vpop.f32.mrf.mxu3 }
 0x1db   : > { %v836_v1 = vpop.f32.mrf.mxu1 }
 0x1dc   : > { %v894_v2 = vadd.f32 %v836_v1, %v767_v61 }
 0x1de   : > { %v2464_v6 = vadd.f32 %v2459_v3, %v894_v2 }
 0x1e0   : > { %v2461_v4 = vpop.f32.mrf.mxu2  ;;  %v773_v5 = vpop.f32.mrf.mxu3  ;;  %v1185_v21 = vmul.f32 %v1169_v8, %v2464_v6  ;;  %v1067_v23 = vmul.f32 %v1051_v9, %v2464_v6  ;;  %v949_v25 = vmul.f32 %v933_v10, %v2464_v6  ;;  %v1244_v27 = vmul.f32 %v1228_v11, %v2464_v6  ;;  %v1053_v10 = vld [vmem:[#allocation7 + $0x110] sm:$0xff] }
 0x1e1   : > { %v880_v7 = vadd.f32 %v773_v5, %v704_v60  ;;  %v1126_v30 = vmul.f32 %v1110_v12, %v2464_v6  ;;  %v1008_v32 = vmul.f32 %v992_v13, %v2464_v6  ;;  %v1421_v34 = vmul.f32 %v1405_v14, %v2464_v6  ;;  %v1171_v5 = vld [vmem:[#allocation7 + $0x210] sm:$0xff] }
 0x1e2   : > { %v1362_v35 = vmul.f32 %v1346_v15, %v2464_v6  ;;  %v1303_v36 = vmul.f32 %v1287_v16, %v2464_v6  ;;  %v1598_v37 = vmul.f32 %v1582_v19, %v2464_v6  ;;  %v1539_v38 = vmul.f32 %v1523_v20, %v2464_v6  ;;  %v935_v11 = vld [vmem:[#allocation7 + $0x10] sm:$0xff] }
 0x1e3   : > { %v839_v40 = vpop.f32.mrf.mxu1  ;;  %v1230_v12 = vld [vmem:[#allocation7 + $0x290] sm:$0xff] }
 0x1e4   : > { %v895_v17 = vadd.f32 %v839_v40, %v770_v0  ;;  %v1480_v40 = vmul.f32 %v1464_v58, %v2464_v6  ;;  %v1112_v16 = vld [vmem:[#allocation7 + $0x190] sm:$0xff]  ;;  %v1231_v58 = vld [vmem:[#allocation7 + $0x298] sm:$0xff] }
 0x1e6   : > { %v915_v28 = vadd.f32 %v2459_v3, %v895_v17  ;;  %v994_v17 = vld [vmem:[#allocation7 + $0x90] sm:$0xff] }
 0x1e8   : > { %v2478_v39 = vpop.f32.mrf.mxu2  ;;  %v776_v41 = vpop.f32.mrf.mxu3  ;;  %v1186_v42 = vmul.f32 %v1170_v18, %v915_v28  ;;  %v1068_v43 = vmul.f32 %v1052_v22, %v915_v28  ;;  %v950_v44 = vmul.f32 %v934_v24, %v915_v28  ;;  %v1245_v45 = vmul.f32 %v1229_v26, %v915_v28  ;;  %v1407_v18 = vld [vmem:[#allocation7 + $0x410] sm:$0xff] }
 0x1e9   : > { %v881_v47 = vadd.f32 %v776_v41, %v707_v63  ;;  %v1127_v48 = vmul.f32 %v1111_v29, %v915_v28  ;;  %v1009_v49 = vmul.f32 %v993_v31, %v915_v28  ;;  %v1422_v50 = vmul.f32 %v1406_v33, %v915_v28  ;;  %v1348_v29 = vld [vmem:[#allocation7 + $0x390] sm:$0xff] }
 0x1ea   : > { %v1201_v54 = vadd.f32 %v1186_v42, %v1185_v21  ;;  %v1083_v55 = vadd.f32 %v1068_v43, %v1067_v23  ;;  %v965_v56 = vadd.f32 %v950_v44, %v949_v25  ;;  %v1260_v57 = vadd.f32 %v1245_v45, %v1244_v27  ;;  %v1584_v33 = vld [vmem:[#allocation7 + $0x590] sm:$0xff] }
 0x1eb   : > { %v842_v60 = vpop.f32.mrf.mxu1  ;;  %v1142_v61 = vadd.f32 %v1127_v48, %v1126_v30  ;;  %v1024_v62 = vadd.f32 %v1009_v49, %v1008_v32  ;;  %v1437_v0 = vadd.f32 %v1422_v50, %v1421_v34  ;;  %v1363_v1 = vmul.f32 %v1347_v46, %v915_v28  ;;  %v1289_v32 = vld [vmem:[#allocation7 + $0x310] sm:$0xff]  ;;  %v1172_v49 = vld [vmem:[#allocation7 + $0x218] sm:$0xff] }
 0x1ec   : > { %v896_v2 = vadd.f32 %v880_v7, %v842_v60  ;;  %v1304_v63 = vmul.f32 %v1288_v51, %v915_v28  ;;  %v1599_v8 = vmul.f32 %v1583_v52, %v915_v28  ;;  %v1540_v9 = vmul.f32 %v1524_v53, %v915_v28  ;;  %v1525_v34 = vld [vmem:[#allocation7 + $0x510] sm:$0xff]  ;;  %v1054_v52 = vld [vmem:[#allocation7 + $0x118] sm:$0xff] }
 0x1ed   : > { %v1378_v13 = vadd.f32 %v1363_v1, %v1362_v35  ;;  %v1481_v14 = vmul.f32 %v1465_v59, %v915_v28  ;;  %v1466_v41 = vld [vmem:[#allocation7 + $0x490] sm:$0xff]  ;;  %v936_v53 = vld [vmem:[#allocation7 + $0x18] sm:$0xff] }
 0x1ee   : > { %v916_v15 = vadd.f32 %v2459_v3, %v896_v2  ;;  %v1319_v19 = vadd.f32 %v1304_v63, %v1303_v36  ;;  %v1614_v20 = vadd.f32 %v1599_v8, %v1598_v37  ;;  %v1555_v21 = vadd.f32 %v1540_v9, %v1539_v38 }
 0x1ef   : > { %v1496_v7 = vadd.f32 %v1481_v14, %v1480_v40  ;;  %v1290_v40 = vld [vmem:[#allocation7 + $0x318] sm:$0xff] }
 0x1f0   : > { %v2482_v22 = vpop.f32.mrf.mxu2  ;;  %v779_v23 = vpop.f32.mrf.mxu3  ;;  %v1187_v24 = vmul.f32 %v1171_v5, %v916_v15  ;;  %v1069_v25 = vmul.f32 %v1053_v10, %v916_v15  ;;  %v951_v26 = vmul.f32 %v935_v11, %v916_v15  ;;  %v1246_v27 = vmul.f32 %v1230_v12, %v916_v15  ;;  %v1349_v10 = vld [vmem:[#allocation7 + $0x398] sm:$0xff] }
 0x1f1   : > { %v882_v6 = vadd.f32 %v779_v23, %v2461_v4  ;;  %v1128_v28 = vmul.f32 %v1112_v16, %v916_v15  ;;  %v1010_v30 = vmul.f32 %v994_v17, %v916_v15  ;;  %v1423_v31 = vmul.f32 %v1407_v18, %v916_v15  ;;  %v1585_v14 = vld [vmem:[#allocation7 + $0x598] sm:$0xff] }
 0x1f2   : > { %v1202_v35 = vadd.f32 %v1201_v54, %v1187_v24  ;;  %v1084_v36 = vadd.f32 %v1083_v55, %v1069_v25  ;;  %v966_v37 = vadd.f32 %v965_v56, %v951_v26  ;;  %v1261_v38 = vadd.f32 %v1260_v57, %v1246_v27  ;;  %v1113_v55 = vld [vmem:[#allocation7 + $0x198] sm:$0xff]  ;;  %v1173_v27 = vld [vmem:[#allocation7 + $0x220] sm:$0xff] }
 0x1f3   : > { %v845_v42 = vpop.f32.mrf.mxu1  ;;  %v1143_v43 = vadd.f32 %v1142_v61, %v1128_v28  ;;  %v1025_v44 = vadd.f32 %v1024_v62, %v1010_v30  ;;  %v1438_v45 = vadd.f32 %v1437_v0, %v1423_v31  ;;  %v1364_v46 = vmul.f32 %v1348_v29, %v916_v15  ;;  %v995_v56 = vld [vmem:[#allocation7 + $0x98] sm:$0xff]  ;;  %v1055_v31 = vld [vmem:[#allocation7 + $0x120] sm:$0xff] }
 0x1f4   : > { %v897_v48 = vadd.f32 %v881_v47, %v845_v42  ;;  %v1305_v50 = vmul.f32 %v1289_v32, %v916_v15  ;;  %v1600_v4 = vmul.f32 %v1584_v33, %v916_v15  ;;  %v1541_v51 = vmul.f32 %v1525_v34, %v916_v15  ;;  %v1408_v57 = vld [vmem:[#allocation7 + $0x418] sm:$0xff]  ;;  %v937_v32 = vld [vmem:[#allocation7 + $0x20] sm:$0xff] }
 0x1f5   : > { %v1379_v59 = vadd.f32 %v1378_v13, %v1364_v46  ;;  %v1482_v60 = vmul.f32 %v1466_v41, %v916_v15  ;;  %v1526_v15 = vld [vmem:[#allocation7 + $0x518] sm:$0xff]  ;;  %v1232_v33 = vld [vmem:[#allocation7 + $0x2a0] sm:$0xff] }
 0x1f6   : > { %v917_v54 = vadd.f32 %v2459_v3, %v897_v48  ;;  %v1320_v1 = vadd.f32 %v1319_v19, %v1305_v50  ;;  %v1615_v61 = vadd.f32 %v1614_v20, %v1600_v4  ;;  %v1556_v62 = vadd.f32 %v1555_v21, %v1541_v51  ;;  %v1467_v20 = vld [vmem:[#allocation7 + $0x498] sm:$0xff]  ;;  %v1350_v50 = vld [vmem:[#allocation7 + $0x3a0] sm:$0xff] }
 0x1f7   : > { %v1497_v0 = vadd.f32 %v1496_v7, %v1482_v60  ;;  %v1527_v60 = vld [vmem:[#allocation7 + $0x520] sm:$0xff] }
 0x1f8   : > { %v2486_v2 = vpop.f32.mrf.mxu2  ;;  %v782_v47 = vpop.f32.mrf.mxu3  ;;  %v1188_v5 = vmul.f32 %v1172_v49, %v917_v54  ;;  %v1070_v63 = vmul.f32 %v1054_v52, %v917_v54  ;;  %v952_v8 = vmul.f32 %v936_v53, %v917_v54  ;;  %v1247_v9 = vmul.f32 %v1231_v58, %v917_v54  ;;  %v1291_v58 = vld [vmem:[#allocation7 + $0x320] sm:$0xff] }
 0x1f9   : > { %v1129_v11 = vmul.f32 %v1113_v55, %v917_v54  ;;  %v1011_v12 = vmul.f32 %v995_v56, %v917_v54  ;;  %v1424_v13 = vmul.f32 %v1408_v57, %v917_v54  ;;  %v1365_v25 = vmul.f32 %v1349_v10, %v917_v54 }
 0x1fa   : > { %v1203_v16 = vadd.f32 %v1202_v35, %v1188_v5  ;;  %v1085_v17 = vadd.f32 %v1084_v36, %v1070_v63  ;;  %v967_v18 = vadd.f32 %v966_v37, %v952_v8  ;;  %v1262_v19 = vadd.f32 %v1261_v38, %v1247_v9  ;;  %v1114_v36 = vld [vmem:[#allocation7 + $0x1a0] sm:$0xff] }
 0x1fb   : > { %v848_v21 = vpop.f32.mrf.mxu1  ;;  %v1144_v7 = vadd.f32 %v1143_v43, %v1129_v11  ;;  %v1026_v23 = vadd.f32 %v1025_v44, %v1011_v12  ;;  %v1439_v24 = vadd.f32 %v1438_v45, %v1424_v13  ;;  %v1306_v29 = vmul.f32 %v1290_v40, %v917_v54  ;;  %v996_v37 = vld [vmem:[#allocation7 + $0xa0] sm:$0xff]  ;;  %v1056_v13 = vld [vmem:[#allocation7 + $0x128] sm:$0xff] }
 0x1fc   : > { %v898_v26 = vadd.f32 %v882_v6, %v848_v21  ;;  %v1601_v28 = vmul.f32 %v1585_v14, %v917_v54  ;;  %v1542_v30 = vmul.f32 %v1526_v15, %v917_v54  ;;  %v1380_v34 = vadd.f32 %v1379_v59, %v1365_v25  ;;  %v1409_v38 = vld [vmem:[#allocation7 + $0x420] sm:$0xff]  ;;  %v938_v40 = vld [vmem:[#allocation7 + $0x28] sm:$0xff] }
 0x1fd   : > { %v1483_v41 = vmul.f32 %v1467_v20, %v917_v54  ;;  %v1321_v42 = vadd.f32 %v1320_v1, %v1306_v29  ;;  %v883_v4 = vadd.f32 %v782_v47, %v2478_v39  ;;  %v1586_v59 = vld [vmem:[#allocation7 + $0x5a0] sm:$0xff]  ;;  %v1174_v47 = vld [vmem:[#allocation7 + $0x228] sm:$0xff] }
 0x1fe   : > { %v918_v35 = vadd.f32 %v2459_v3, %v898_v26  ;;  %v1616_v43 = vadd.f32 %v1615_v61, %v1601_v28  ;;  %v1557_v44 = vadd.f32 %v1556_v62, %v1542_v30  ;;  %v1468_v62 = vld [vmem:[#allocation7 + $0x4a0] sm:$0xff]  ;;  %v1233_v14 = vld [vmem:[#allocation7 + $0x2a8] sm:$0xff] }
 0x1ff   : > { %v1498_v45 = vadd.f32 %v1497_v0, %v1483_v41  ;;  %v1351_v28 = vld [vmem:[#allocation7 + $0x3a8] sm:$0xff] }
 0x200   : > { %v1189_v46 = vmul.f32 %v1173_v27, %v918_v35  ;;  %v1071_v6 = vmul.f32 %v1055_v31, %v918_v35  ;;  %v953_v48 = vmul.f32 %v937_v32, %v918_v35  ;;  %v1248_v49 = vmul.f32 %v1232_v33, %v918_v35  ;;  %v2490_v54 = vpop.f32.mrf.mxu2  ;;  %v785_v55 = vpop.f32.mrf.mxu3  ;;  %v1587_v41 = vld [vmem:[#allocation7 + $0x5a8] sm:$0xff] }
 0x201   : > { %v1130_v51 = vmul.f32 %v1114_v36, %v918_v35  ;;  %v1012_v52 = vmul.f32 %v996_v37, %v918_v35  ;;  %v1425_v53 = vmul.f32 %v1409_v38, %v918_v35  ;;  %v1366_v9 = vmul.f32 %v1350_v50, %v918_v35 }
 0x202   : > { %v1204_v56 = vadd.f32 %v1203_v16, %v1189_v46  ;;  %v1086_v57 = vadd.f32 %v1085_v17, %v1071_v6  ;;  %v968_v1 = vadd.f32 %v967_v18, %v953_v48  ;;  %v1263_v61 = vadd.f32 %v1262_v19, %v1248_v49  ;;  %v1115_v17 = vld [vmem:[#allocation7 + $0x1a8] sm:$0xff] }
 0x203   : > { %v851_v0 = vpop.f32.mrf.mxu1  ;;  %v1145_v5 = vadd.f32 %v1144_v7, %v1130_v51  ;;  %v1027_v63 = vadd.f32 %v1026_v23, %v1012_v52  ;;  %v1440_v8 = vadd.f32 %v1439_v24, %v1425_v53  ;;  %v1307_v10 = vmul.f32 %v1291_v58, %v918_v35  ;;  %v997_v18 = vld [vmem:[#allocation7 + $0xa8] sm:$0xff]  ;;  %v1057_v58 = vld [vmem:[#allocation7 + $0x130] sm:$0xff] }
 0x204   : > { %v899_v39 = vadd.f32 %v883_v4, %v851_v0  ;;  %v1602_v11 = vmul.f32 %v1586_v59, %v918_v35  ;;  %v1543_v12 = vmul.f32 %v1527_v60, %v918_v35  ;;  %v1381_v15 = vadd.f32 %v1380_v34, %v1366_v9  ;;  %v1410_v19 = vld [vmem:[#allocation7 + $0x428] sm:$0xff]  ;;  %v1175_v4 = vld [vmem:[#allocation7 + $0x230] sm:$0xff] }
 0x205   : > { %v1484_v20 = vmul.f32 %v1468_v62, %v918_v35  ;;  %v1322_v21 = vadd.f32 %v1321_v42, %v1307_v10  ;;  %v884_v30 = vadd.f32 %v785_v55, %v2482_v22  ;;  %v1292_v34 = vld [vmem:[#allocation7 + $0x328] sm:$0xff]  ;;  %v939_v59 = vld [vmem:[#allocation7 + $0x30] sm:$0xff] }
 0x206   : > { %v919_v16 = vadd.f32 %v2459_v3, %v899_v39  ;;  %v1617_v7 = vadd.f32 %v1616_v43, %v1602_v11  ;;  %v1558_v23 = vadd.f32 %v1557_v44, %v1543_v12  ;;  %v1528_v35 = vld [vmem:[#allocation7 + $0x528] sm:$0xff]  ;;  %v1234_v60 = vld [vmem:[#allocation7 + $0x2b0] sm:$0xff] }
 0x207   : > { %v1499_v24 = vadd.f32 %v1498_v45, %v1484_v20  ;;  %v1469_v43 = vld [vmem:[#allocation7 + $0x4a8] sm:$0xff]  ;;  %v1411_v62 = vld [vmem:[#allocation7 + $0x430] sm:$0xff] }
 0x208   : > { %v1190_v25 = vmul.f32 %v1174_v47, %v919_v16  ;;  %v1072_v26 = vmul.f32 %v1056_v13, %v919_v16  ;;  %v954_v27 = vmul.f32 %v938_v40, %v919_v16  ;;  %v1249_v29 = vmul.f32 %v1233_v14, %v919_v16  ;;  %v2494_v49 = vpop.f32.mrf.mxu2  ;;  %v788_v50 = vpop.f32.mrf.mxu3  ;;  %v1352_v11 = vld [vmem:[#allocation7 + $0x3b0] sm:$0xff] }
 0x209   : > { %v1131_v31 = vmul.f32 %v1115_v17, %v919_v16  ;;  %v1013_v32 = vmul.f32 %v997_v18, %v919_v16  ;;  %v1426_v33 = vmul.f32 %v1410_v19, %v919_v16  ;;  %v1367_v48 = vmul.f32 %v1351_v28, %v919_v16  ;;  %v1293_v12 = vld [vmem:[#allocation7 + $0x330] sm:$0xff] }
 0x20a   : > { %v1205_v36 = vadd.f32 %v1204_v56, %v1190_v25  ;;  %v1087_v37 = vadd.f32 %v1086_v57, %v1072_v26  ;;  %v969_v38 = vadd.f32 %v968_v1, %v954_v27  ;;  %v1264_v42 = vadd.f32 %v1263_v61, %v1249_v29  ;;  %v1116_v1 = vld [vmem:[#allocation7 + $0x1b0] sm:$0xff] }
 0x20b   : > { %v854_v44 = vpop.f32.mrf.mxu1  ;;  %v1146_v45 = vadd.f32 %v1145_v5, %v1131_v31  ;;  %v1028_v46 = vadd.f32 %v1027_v63, %v1013_v32  ;;  %v1441_v6 = vadd.f32 %v1440_v8, %v1426_v33  ;;  %v1308_v51 = vmul.f32 %v1292_v34, %v919_v16  ;;  %v998_v61 = vld [vmem:[#allocation7 + $0xb0] sm:$0xff] }
 0x20c   : > { %v900_v22 = vadd.f32 %v884_v30, %v854_v44  ;;  %v1603_v52 = vmul.f32 %v1587_v41, %v919_v16  ;;  %v1544_v53 = vmul.f32 %v1528_v35, %v919_v16  ;;  %v1382_v55 = vadd.f32 %v1381_v15, %v1367_v48  ;;  %v1588_v15 = vld [vmem:[#allocation7 + $0x5b0] sm:$0xff]  ;;  %v940_v44 = vld [vmem:[#allocation7 + $0x38] sm:$0xff] }
 0x20d   : > { %v1485_v56 = vmul.f32 %v1469_v43, %v919_v16  ;;  %v1323_v0 = vadd.f32 %v1322_v21, %v1308_v51  ;;  %v1529_v20 = vld [vmem:[#allocation7 + $0x530] sm:$0xff]  ;;  %v1058_v43 = vld [vmem:[#allocation7 + $0x138] sm:$0xff] }
 0x20e   : > { %v920_v57 = vadd.f32 %v2459_v3, %v900_v22  ;;  %v1618_v5 = vadd.f32 %v1617_v7, %v1603_v52  ;;  %v1559_v63 = vadd.f32 %v1558_v23, %v1544_v53  ;;  %v1470_v16 = vld [vmem:[#allocation7 + $0x4b0] sm:$0xff]  ;;  %v999_v48 = vld [vmem:[#allocation7 + $0xb8] sm:$0xff] }
 0x20f   : > { %v1500_v8 = vadd.f32 %v1499_v24, %v1485_v56  ;;  %v1412_v22 = vld [vmem:[#allocation7 + $0x438] sm:$0xff] }
 0x210   : > { %v1191_v9 = vmul.f32 %v1175_v4, %v920_v57  ;;  %v1073_v39 = vmul.f32 %v1057_v58, %v920_v57  ;;  %v955_v47 = vmul.f32 %v939_v59, %v920_v57  ;;  %v1250_v10 = vmul.f32 %v1234_v60, %v920_v57  ;;  %v2497_v31 = vpop.f32.mrf.mxu2  ;;  %v791_v32 = vpop.f32.mrf.mxu3 }
 0x211   : > { %v1132_v13 = vmul.f32 %v1116_v1, %v920_v57  ;;  %v1014_v40 = vmul.f32 %v998_v61, %v920_v57  ;;  %v1427_v14 = vmul.f32 %v1411_v62, %v920_v57  ;;  %v1368_v24 = vmul.f32 %v1352_v11, %v920_v57  ;;  %v1589_v1 = vld [vmem:[#allocation7 + $0x5b8] sm:$0xff] }
 0x212   : > { %v1206_v17 = vadd.f32 %v1205_v36, %v1191_v9  ;;  %v1088_v18 = vadd.f32 %v1087_v37, %v1073_v39  ;;  %v970_v19 = vadd.f32 %v969_v38, %v955_v47  ;;  %v1265_v25 = vadd.f32 %v1264_v42, %v1250_v10  ;;  %v1176_v42 = vld [vmem:[#allocation7 + $0x238] sm:$0xff] }
 0x213   : > { %v1147_v21 = vadd.f32 %v1146_v45, %v1132_v13  ;;  %v1029_v7 = vadd.f32 %v1028_v46, %v1014_v40  ;;  %v1442_v23 = vadd.f32 %v1441_v6, %v1427_v14  ;;  %v1309_v26 = vmul.f32 %v1293_v12, %v920_v57  ;;  %v1235_v45 = vld [vmem:[#allocation7 + $0x2b8] sm:$0xff]  ;;  %v1177_v13 = vld [vmem:[#allocation7 + $0x240] sm:$0xff] }
 0x214   : > { %v1604_v27 = vmul.f32 %v1588_v15, %v920_v57  ;;  %v1545_v29 = vmul.f32 %v1529_v20, %v920_v57  ;;  %v1486_v28 = vmul.f32 %v1470_v16, %v920_v57  ;;  %v1383_v30 = vadd.f32 %v1382_v55, %v1368_v24  ;;  %v1117_v6 = vld [vmem:[#allocation7 + $0x1b8] sm:$0xff]  ;;  %v1059_v15 = vld [vmem:[#allocation7 + $0x140] sm:$0xff] }
 0x215   : > { %v1324_v33 = vadd.f32 %v1323_v0, %v1309_v26  ;;  %v885_v36 = vadd.f32 %v788_v50, %v2486_v2  ;;  %v1353_v2 = vld [vmem:[#allocation7 + $0x3b8] sm:$0xff]  ;;  %v886_v50 = vadd.f32 %v791_v32, %v2490_v54  ;;  %v941_v20 = vld [vmem:[#allocation7 + $0x40] sm:$0xff] }
 0x216   : > { %v1619_v34 = vadd.f32 %v1618_v5, %v1604_v27  ;;  %v1560_v41 = vadd.f32 %v1559_v63, %v1545_v29  ;;  %v1501_v35 = vadd.f32 %v1500_v8, %v1486_v28  ;;  %v1294_v57 = vld [vmem:[#allocation7 + $0x338] sm:$0xff]  ;;  %v1236_v16 = vld [vmem:[#allocation7 + $0x2c0] sm:$0xff] }
 0x217   : > { %v1530_v61 = vld [vmem:[#allocation7 + $0x538] sm:$0xff] }
 0x218   : > { %v1471_v8 = vld [vmem:[#allocation7 + $0x4b8] sm:$0xff] }
 0x219   : > { %v857_v37 = vpop.f32.mrf.mxu1 }
 0x21a   : > { %v901_v38 = vadd.f32 %v885_v36, %v857_v37 }
 0x21c   : > { %v921_v46 = vadd.f32 %v2459_v3, %v901_v38 }
 0x21e   : > { %v2501_v4 = vpop.f32.mrf.mxu2  ;;  %v2503_v51 = vpop.f32.mrf.mxu3  ;;  %v1192_v52 = vmul.f32 %v1176_v42, %v921_v46  ;;  %v1074_v53 = vmul.f32 %v1058_v43, %v921_v46  ;;  %v956_v58 = vmul.f32 %v940_v44, %v921_v46  ;;  %v1251_v59 = vmul.f32 %v1235_v45, %v921_v46  ;;  %v1354_v42 = vld [vmem:[#allocation7 + $0x3c0] sm:$0xff] }
 0x21f   : > { %v1133_v60 = vmul.f32 %v1117_v6, %v921_v46  ;;  %v1015_v55 = vmul.f32 %v999_v48, %v921_v46  ;;  %v1428_v56 = vmul.f32 %v1412_v22, %v921_v46  ;;  %v1369_v11 = vmul.f32 %v1353_v2, %v921_v46  ;;  %v1295_v45 = vld [vmem:[#allocation7 + $0x340] sm:$0xff] }
 0x220   : > { %v1207_v62 = vadd.f32 %v1206_v17, %v1192_v52  ;;  %v1089_v0 = vadd.f32 %v1088_v18, %v1074_v53  ;;  %v971_v5 = vadd.f32 %v970_v19, %v956_v58  ;;  %v1266_v63 = vadd.f32 %v1265_v25, %v1251_v59  ;;  %v1118_v18 = vld [vmem:[#allocation7 + $0x1c0] sm:$0xff] }
 0x221   : > { %v860_v9 = vpop.f32.mrf.mxu1  ;;  %v1148_v39 = vadd.f32 %v1147_v21, %v1133_v60  ;;  %v1030_v47 = vadd.f32 %v1029_v7, %v1015_v55  ;;  %v1443_v10 = vadd.f32 %v1442_v23, %v1428_v56  ;;  %v1310_v40 = vmul.f32 %v1294_v57, %v921_v46  ;;  %v1000_v19 = vld [vmem:[#allocation7 + $0xc0] sm:$0xff] }
 0x222   : > { %v902_v12 = vadd.f32 %v886_v50, %v860_v9  ;;  %v1605_v54 = vmul.f32 %v1589_v1, %v921_v46  ;;  %v1546_v14 = vmul.f32 %v1530_v61, %v921_v46  ;;  %v1384_v24 = vadd.f32 %v1383_v30, %v1369_v11  ;;  %v1413_v25 = vld [vmem:[#allocation7 + $0x440] sm:$0xff] }
 0x223   : > { %v1487_v26 = vmul.f32 %v1471_v8, %v921_v46  ;;  %v1325_v27 = vadd.f32 %v1324_v33, %v1310_v40  ;;  %v1590_v46 = vld [vmem:[#allocation7 + $0x5c0] sm:$0xff]  ;;  %v887_v8 = vadd.f32 %v2503_v51, %v2494_v49  ;;  %v1060_v40 = vld [vmem:[#allocation7 + $0x148] sm:$0xff] }
 0x224   : > { %v922_v17 = vadd.f32 %v2459_v3, %v902_v12  ;;  %v1620_v21 = vadd.f32 %v1619_v34, %v1605_v54  ;;  %v1561_v7 = vadd.f32 %v1560_v41, %v1546_v14  ;;  %v1531_v6 = vld [vmem:[#allocation7 + $0x540] sm:$0xff]  ;;  %v942_v14 = vld [vmem:[#allocation7 + $0x48] sm:$0xff] }
 0x225   : > { %v1502_v23 = vadd.f32 %v1501_v35, %v1487_v26  ;;  %v1472_v41 = vld [vmem:[#allocation7 + $0x4c0] sm:$0xff]  ;;  %v1355_v26 = vld [vmem:[#allocation7 + $0x3c8] sm:$0xff] }
 0x226   : > { %v2507_v29 = vpop.f32.mrf.mxu2  ;;  %v797_v28 = vpop.f32.mrf.mxu3  ;;  %v1193_v32 = vmul.f32 %v1177_v13, %v922_v17  ;;  %v1075_v36 = vmul.f32 %v1059_v15, %v922_v17  ;;  %v957_v37 = vmul.f32 %v941_v20, %v922_v17  ;;  %v1252_v38 = vmul.f32 %v1236_v16, %v922_v17  ;;  %v1178_v13 = vld [vmem:[#allocation7 + $0x248] sm:$0xff] }
 0x227   : > { %v1134_v43 = vmul.f32 %v1118_v18, %v922_v17  ;;  %v1016_v30 = vmul.f32 %v1000_v19, %v922_v17  ;;  %v1429_v44 = vmul.f32 %v1413_v25, %v922_v17  ;;  %v1370_v59 = vmul.f32 %v1354_v42, %v922_v17  ;;  %v1237_v15 = vld [vmem:[#allocation7 + $0x2c8] sm:$0xff] }
 0x228   : > { %v1208_v48 = vadd.f32 %v1207_v62, %v1193_v32  ;;  %v1090_v22 = vadd.f32 %v1089_v0, %v1075_v36  ;;  %v2509_v33 = vadd.f32 %v971_v5, %v957_v37  ;;  %v2511_v34 = vadd.f32 %v1266_v63, %v1252_v38  ;;  %v1119_v20 = vld [vmem:[#allocation7 + $0x1c8] sm:$0xff]  ;;  %v1179_v36 = vld [vmem:[#allocation7 + $0x250] sm:$0xff] }
 0x229   : > { %v863_v35 = vpop.f32.mrf.mxu1  ;;  %v2513_v52 = vadd.f32 %v1148_v39, %v1134_v43  ;;  %v2515_v53 = vadd.f32 %v1030_v47, %v1016_v30  ;;  %v2517_v58 = vadd.f32 %v1443_v10, %v1429_v44  ;;  %v1311_v2 = vmul.f32 %v1295_v45, %v922_v17  ;;  %v1001_v16 = vld [vmem:[#allocation7 + $0xc8] sm:$0xff]  ;;  %v1061_v43 = vld [vmem:[#allocation7 + $0x150] sm:$0xff] }
 0x22a   : > { %v1606_v50 = vmul.f32 %v1590_v46, %v922_v17  ;;  %v1547_v60 = vmul.f32 %v1531_v6, %v922_v17  ;;  %v1385_v55 = vadd.f32 %v1384_v24, %v1370_v59  ;;  %v1488_v56 = vmul.f32 %v1472_v41, %v922_v17  ;;  %v1414_v24 = vld [vmem:[#allocation7 + $0x448] sm:$0xff] }
 0x22b   : > { %v2519_v57 = vadd.f32 %v1325_v27, %v1311_v2  ;;  %v903_v9 = vadd.f32 %v887_v8, %v863_v35  ;;  %v888_v10 = vadd.f32 %v797_v28, %v2497_v31  ;;  %v1296_v17 = vld [vmem:[#allocation7 + $0x348] sm:$0xff]  ;;  %v943_v35 = vld [vmem:[#allocation7 + $0x50] sm:$0xff] }
 0x22c   : > { %v2521_v1 = vadd.f32 %v1620_v21, %v1606_v50  ;;  %v2523_v61 = vadd.f32 %v1561_v7, %v1547_v60  ;;  %v2525_v62 = vadd.f32 %v1502_v23, %v1488_v56  ;;  %v1591_v18 = vld [vmem:[#allocation7 + $0x5c8] sm:$0xff]  ;;  %v1238_v60 = vld [vmem:[#allocation7 + $0x2d0] sm:$0xff] }
 0x22d   : > { %v923_v11 = vadd.f32 %v2459_v3, %v903_v9  ;;  %v1532_v19 = vld [vmem:[#allocation7 + $0x548] sm:$0xff]  ;;  %v1120_v56 = vld [vmem:[#allocation7 + $0x1d0] sm:$0xff] }
 0x22e   : > { %v2527_v0 = vpop.f32.mrf.mxu2  ;;  %v800_v5 = vpop.f32.mrf.mxu3  ;;  %v1473_v28 = vld [vmem:[#allocation7 + $0x4c8] sm:$0xff]  ;;  %v1002_v8 = vld [vmem:[#allocation7 + $0xd0] sm:$0xff] }
 0x22f   : > { %v1194_v49 = vmul.f32 %v1178_v13, %v923_v11  ;;  %v1076_v51 = vmul.f32 %v1060_v40, %v923_v11  ;;  %v958_v21 = vmul.f32 %v942_v14, %v923_v11  ;;  %v1253_v7 = vmul.f32 %v1237_v15, %v923_v11  ;;  %v1297_v13 = vld [vmem:[#allocation7 + $0x350] sm:$0xff] }
 0x230   : > { %v1135_v23 = vmul.f32 %v1119_v20, %v923_v11  ;;  %v889_v32 = vadd.f32 %v800_v5, %v2501_v4  ;;  %v1017_v37 = vmul.f32 %v1001_v16, %v923_v11  ;;  %v1430_v38 = vmul.f32 %v1414_v24, %v923_v11  ;;  %v1592_v40 = vld [vmem:[#allocation7 + $0x5d0] sm:$0xff] }
 0x231   : > { %v866_v63 = vpop.f32.mrf.mxu1  ;;  %v1371_v42 = vmul.f32 %v1355_v26, %v923_v11  ;;  %v1312_v30 = vmul.f32 %v1296_v17, %v923_v11  ;;  %v1607_v44 = vmul.f32 %v1591_v18, %v923_v11  ;;  %v1548_v45 = vmul.f32 %v1532_v19, %v923_v11  ;;  %v1474_v15 = vld [vmem:[#allocation7 + $0x4d0] sm:$0xff]  ;;  %v944_v18 = vld [vmem:[#allocation7 + $0x58] sm:$0xff] }
 0x232   : > { %v904_v12 = vadd.f32 %v888_v10, %v866_v63  ;;  %v1209_v6 = vadd.f32 %v1208_v48, %v1194_v49  ;;  %v1091_v41 = vadd.f32 %v1090_v22, %v1076_v51  ;;  %v1489_v59 = vmul.f32 %v1473_v28, %v923_v11  ;;  %v1415_v10 = vld [vmem:[#allocation7 + $0x450] sm:$0xff]  ;;  %v1239_v19 = vld [vmem:[#allocation7 + $0x2d8] sm:$0xff] }
 0x233   : > { %v973_v50 = vadd.f32 %v2509_v33, %v958_v21  ;;  %v1268_v4 = vadd.f32 %v2511_v34, %v1253_v7  ;;  %v1150_v5 = vadd.f32 %v2513_v52, %v1135_v23  ;;  %v1032_v9 = vadd.f32 %v2515_v53, %v1017_v37  ;;  %v1121_v21 = vld [vmem:[#allocation7 + $0x1d8] sm:$0xff] }
 0x234   : > { %v2538_v25 = vadd.f32 %v2459_v3, %v904_v12  ;;  %v1445_v48 = vadd.f32 %v2517_v58, %v1430_v38  ;;  %v1386_v22 = vadd.f32 %v1385_v55, %v1371_v42  ;;  %v1356_v12 = vld [vmem:[#allocation7 + $0x3d0] sm:$0xff]  ;;  %v1327_v33 = vadd.f32 %v2519_v57, %v1312_v30 }
 0x235   : > { %v1622_v34 = vadd.f32 %v2521_v1, %v1607_v44  ;;  %v1563_v52 = vadd.f32 %v2523_v61, %v1548_v45  ;;  %v1533_v55 = vld [vmem:[#allocation7 + $0x550] sm:$0xff]  ;;  %v1504_v20 = vadd.f32 %v2525_v62, %v1489_v59  ;;  %v1180_v1 = vld [vmem:[#allocation7 + $0x258] sm:$0xff] }
 0x236   : > { %v2531_v39 = vpop.f32.mrf.mxu2  ;;  %v2533_v47 = vpop.f32.mrf.mxu3  ;;  %v1195_v2 = vmul.f32 %v1179_v36, %v2538_v25  ;;  %v1077_v63 = vmul.f32 %v1061_v43, %v2538_v25  ;;  %v959_v11 = vmul.f32 %v943_v35, %v2538_v25  ;;  %v1254_v53 = vmul.f32 %v1238_v60, %v2538_v25  ;;  %v1062_v61 = vld [vmem:[#allocation7 + $0x158] sm:$0xff] }
 0x237   : > { %v1136_v58 = vmul.f32 %v1120_v56, %v2538_v25  ;;  %v890_v57 = vadd.f32 %v2533_v47, %v2507_v29  ;;  %v1018_v49 = vmul.f32 %v1002_v8, %v2538_v25  ;;  %v1431_v51 = vmul.f32 %v1415_v10, %v2538_v25  ;;  %v1003_v45 = vld [vmem:[#allocation7 + $0xd8] sm:$0xff]  ;;  %v1181_v56 = vld [vmem:[#allocation7 + $0x260] sm:$0xff] }
 0x238   : > { %v1210_v26 = vadd.f32 %v1209_v6, %v1195_v2  ;;  %v1092_v17 = vadd.f32 %v1091_v41, %v1077_v63  ;;  %v1372_v7 = vmul.f32 %v1356_v12, %v2538_v25  ;;  %v1313_v62 = vmul.f32 %v1297_v13, %v2538_v25  ;;  %v1416_v6 = vld [vmem:[#allocation7 + $0x458] sm:$0xff]  ;;  %v945_v12 = vld [vmem:[#allocation7 + $0x60] sm:$0xff] }
 0x239   : > { %v869_v54 = vpop.f32.mrf.mxu1  ;;  %v1608_v23 = vmul.f32 %v1592_v40, %v2538_v25  ;;  %v974_v47 = vadd.f32 %v973_v50, %v959_v11  ;;  %v1549_v28 = vmul.f32 %v1533_v55, %v2538_v25  ;;  %v1269_v38 = vadd.f32 %v1268_v4, %v1254_v53  ;;  %v1357_v35 = vld [vmem:[#allocation7 + $0x3d8] sm:$0xff]  ;;  %v1063_v11 = vld [vmem:[#allocation7 + $0x160] sm:$0xff] }
 0x23a   : > { %v905_v46 = vadd.f32 %v889_v32, %v869_v54  ;;  %v1490_v32 = vmul.f32 %v1474_v15, %v2538_v25  ;;  %v1151_v42 = vadd.f32 %v1150_v5, %v1136_v58  ;;  %v1446_v41 = vadd.f32 %v1445_v48, %v1431_v51  ;;  %v1298_v2 = vld [vmem:[#allocation7 + $0x358] sm:$0xff]  ;;  %v1122_v58 = vld [vmem:[#allocation7 + $0x1e0] sm:$0xff] }
 0x23b   : > { %v1387_v59 = vadd.f32 %v1386_v22, %v1372_v7  ;;  %v1328_v25 = vadd.f32 %v1327_v33, %v1313_v62  ;;  %v1623_v50 = vadd.f32 %v1622_v34, %v1608_v23  ;;  %v1593_v5 = vld [vmem:[#allocation7 + $0x5d8] sm:$0xff]  ;;  %v1564_v8 = vadd.f32 %v1563_v52, %v1549_v28  ;;  %v1004_v52 = vld [vmem:[#allocation7 + $0xe0] sm:$0xff]  ;;  %v1065_v28 = vld [vmem:[#allocation7 + $0x170] sm:$0xff] }
 0x23c   : > { %v2557_v54 = vadd.f32 %v2459_v3, %v905_v46  ;;  %v1033_v46 = vadd.f32 %v1032_v9, %v1018_v49  ;;  %v1534_v63 = vld [vmem:[#allocation7 + $0x558] sm:$0xff]  ;;  %v1505_v10 = vadd.f32 %v1504_v20, %v1490_v32  ;;  %v1417_v15 = vld [vmem:[#allocation7 + $0x460] sm:$0xff]  ;;  %v1242_v32 = vld [vmem:[#allocation7 + $0x2f0] sm:$0xff] }
 0x23d   : > { %v1475_v33 = vld [vmem:[#allocation7 + $0x4d8] sm:$0xff] }
 0x23e   : > { %v2540_v31 = vpop.f32.mrf.mxu2  ;;  %v2542_v27 = vpop.f32.mrf.mxu3  ;;  %v1196_v36 = vmul.f32 %v1180_v1, %v2557_v54  ;;  %v1078_v37 = vmul.f32 %v1062_v61, %v2557_v54  ;;  %v960_v43 = vmul.f32 %v944_v18, %v2557_v54  ;;  %v1255_v30 = vmul.f32 %v1239_v19, %v2557_v54 }
 0x23f   : > { %v1137_v44 = vmul.f32 %v1121_v21, %v2557_v54  ;;  %v2578_v60 = vadd.f32 %v2542_v27, %v2527_v0  ;;  %v1019_v22 = vmul.f32 %v1003_v45, %v2557_v54  ;;  %v1432_v13 = vmul.f32 %v1416_v6, %v2557_v54  ;;  %v1183_v21 = vld [vmem:[#allocation7 + $0x270] sm:$0xff]  ;;  %v1887_v6 = vld [vmem:[%s2707_s6] ss:$0 sm:$0xff] }
 0x240   : > { %v1211_v9 = vadd.f32 %v1210_v26, %v1196_v36  ;;  %v1093_v48 = vadd.f32 %v1092_v17, %v1078_v37  ;;  %v975_v34 = vadd.f32 %v974_v47, %v960_v43  ;;  %v1270_v53 = vadd.f32 %v1269_v38, %v1255_v30  ;;  %v1299_v47 = vld [vmem:[#allocation7 + $0x360] sm:$0xff]  ;;  %v1124_v30 = vld [vmem:[#allocation7 + $0x1f0] sm:$0xff] }
 0x241   : > { %v872_v14 = vpop.f32.mrf.mxu1  ;;  %v1152_v55 = vadd.f32 %v1151_v42, %v1137_v44  ;;  %v1373_v20 = vmul.f32 %v1357_v35, %v2557_v54  ;;  %v1550_v1 = vmul.f32 %v1534_v63, %v2557_v54  ;;  %v1491_v61 = vmul.f32 %v1475_v33, %v2557_v54  ;;  %v1006_v44 = vld [vmem:[#allocation7 + $0xf0] sm:$0xff]  ;;  %v1184_v35 = vld [vmem:[#allocation7 + $0x278] sm:$0xff]  ;;  %v1064_v33 = vld [vmem:[#allocation7 + $0x168] sm:$0xff] }
 0x242   : > { %v906_v29 = vadd.f32 %v890_v57, %v872_v14  ;;  %v1240_v14 = vld [vmem:[#allocation7 + $0x2e0] sm:$0xff]  ;;  %v1314_v57 = vmul.f32 %v1298_v2, %v2557_v54  ;;  %v1034_v18 = vadd.f32 %v1033_v46, %v1019_v22  ;;  %v1447_v23 = vadd.f32 %v1446_v41, %v1432_v13  ;;  %v1419_v45 = vld [vmem:[#allocation7 + $0x470] sm:$0xff]  ;;  %v1182_v13 = vld [vmem:[#allocation7 + $0x268] sm:$0xff] }
 0x243   : > { %v2606_v38 = vadd.f32 %v1564_v8, %v1550_v1  ;;  %v2608_v46 = vadd.f32 %v1505_v10, %v1491_v61  ;;  %v948_v8 = vld [vmem:[#allocation7 + $0x78] sm:$0xff]  ;;  %v1005_v1 = vld [vmem:[#allocation7 + $0xe8] sm:$0xff] }
 0x244   : > { %v2581_v4 = vadd.f32 %v2459_v3, %v906_v29  ;;  %v1358_v29 = vld [vmem:[#allocation7 + $0x3e0] sm:$0xff]  ;;  %v2602_v36 = vadd.f32 %v1328_v25, %v1314_v57  ;;  %v1125_v10 = vld [vmem:[#allocation7 + $0x1f8] sm:$0xff] }
 0x246   : > { %v746_v16 = vpop.f32.mrf.mxu2  ;;  %v809_v24 = vpop.f32.mrf.mxu3  ;;  %v1197_v26 = vmul.f32 %v1181_v56, %v2581_v4  ;;  %v1256_v51 = vmul.f32 %v1240_v14, %v2581_v4  ;;  %v1138_v17 = vmul.f32 %v1122_v58, %v2581_v4  ;;  %v1020_v7 = vmul.f32 %v1004_v52, %v2581_v4  ;;  %v946_v14 = vld [vmem:[#allocation7 + $0x68] sm:$0xff] }
 0x247   : > { %v892_v0 = vadd.f32 %v809_v24, %v2531_v39  ;;  %v1609_v16 = vmul.f32 %v1593_v5, %v2557_v54  ;;  %v1079_v39 = vmul.f32 %v1063_v11, %v2581_v4  ;;  %v961_v24 = vmul.f32 %v945_v12, %v2581_v4  ;;  %v947_v54 = vld [vmem:[#allocation7 + $0x70] sm:$0xff]  ;;  %v1123_v58 = vld [vmem:[#allocation7 + $0x1e8] sm:$0xff] }
 0x248   : > { %v1433_v62 = vmul.f32 %v1417_v15, %v2581_v4  ;;  %v1271_v2 = vadd.f32 %v1270_v53, %v1256_v51  ;;  %v1153_v25 = vadd.f32 %v1152_v55, %v1138_v17  ;;  %v1374_v56 = vmul.f32 %v1358_v29, %v2581_v4  ;;  %v1241_v53 = vld [vmem:[#allocation7 + $0x2e8] sm:$0xff] }
 0x249   : > { %v2598_v19 = vadd.f32 %v2459_v3, %v892_v0  ;;  %v2604_v37 = vadd.f32 %v1623_v50, %v1609_v16  ;;  %v1212_v3 = vadd.f32 %v1211_v9, %v1197_v26  ;;  %v1094_v42 = vadd.f32 %v1093_v48, %v1079_v39  ;;  %v1360_v50 = vld [vmem:[#allocation7 + $0x3f0] sm:$0xff]  ;;  %v1243_v9 = vld [vmem:[#allocation7 + $0x2f8] sm:$0xff]  ;;  %v1418_v26 = vld [vmem:[#allocation7 + $0x468] sm:$0xff] }
 0x24a   : > { %v976_v43 = vadd.f32 %v975_v34, %v961_v24  ;;  %v1035_v11 = vadd.f32 %v1034_v18, %v1020_v7  ;;  %v1448_v48 = vadd.f32 %v1447_v23, %v1433_v62  ;;  %v2618_v12 = vmul.f32 %v1299_v47, %v2581_v4  ;;  %v1007_v34 = vld [vmem:[#allocation7 + $0xf8] sm:$0xff]  ;;  %v1359_v39 = vld [vmem:[#allocation7 + $0x3e8] sm:$0xff] }
 0x24b   : > { %v1199_v63 = vmul.f32 %v1183_v21, %v2598_v19  ;;  %v1081_v0 = vmul.f32 %v1065_v28, %v2598_v19  ;;  %v1140_v55 = vmul.f32 %v1124_v30, %v2598_v19  ;;  %v1022_v52 = vmul.f32 %v1006_v44, %v2598_v19 }
 0x24c   : > { %v1435_v15 = vmul.f32 %v1419_v45, %v2598_v19 }
 0x24e   : > { %v748_v27 = vpop.f32.mrf.mxu2  ;;  %v812_v40 = vpop.f32.mrf.mxu3 }
 0x24f   : > { %v893_v49 = vadd.f32 %v812_v40, %v2540_v31  ;;  %v1388_v31 = vadd.f32 %v1387_v59, %v1373_v20  ;;  %v1066_v59 = vld [vmem:[#allocation7 + $0x178] sm:$0xff]  ;;  %v963_v27 = vmul.f32 %v947_v54, %v2598_v19  ;;  %v1258_v40 = vmul.f32 %v1242_v32, %v2598_v19 }
 0x251   : > { %v2613_v41 = vadd.f32 %v1887_v6, %v893_v49  ;;  %v1389_v24 = vadd.f32 %v1388_v31, %v1374_v56 }
 0x253   : > { %v1200_v57 = vmul.f32 %v1184_v35, %v2613_v41  ;;  %v1082_v16 = vmul.f32 %v1066_v59, %v2613_v41  ;;  %v964_v61 = vmul.f32 %v948_v8, %v2613_v41  ;;  %v1259_v49 = vmul.f32 %v1243_v9, %v2613_v41  ;;  %v1420_v8 = vld [vmem:[#allocation7 + $0x478] sm:$0xff] }
 0x254   : > { %v1141_v51 = vmul.f32 %v1125_v10, %v2613_v41  ;;  %v1023_v17 = vmul.f32 %v1007_v34, %v2613_v41  ;;  %v1361_v9 = vld [vmem:[#allocation7 + $0x3f8] sm:$0xff] }
 0x256   : > { %v875_v5 = vpop.f32.mrf.mxu2 }
 0x257   : > { %v907_v22 = vadd.f32 %v2578_v60, %v875_v5  ;;  %v1376_v60 = vmul.f32 %v1360_v50, %v2598_v19 }
 0x259   : > { %v2628_v20 = vadd.f32 %v1887_v6, %v907_v22 }
 0x25b   : > { %v1198_v18 = vmul.f32 %v1182_v13, %v2628_v20  ;;  %v1080_v21 = vmul.f32 %v1064_v33, %v2628_v20  ;;  %v962_v7 = vmul.f32 %v946_v14, %v2628_v20  ;;  %v1257_v62 = vmul.f32 %v1241_v53, %v2628_v20  ;;  %v1535_v53 = vld [vmem:[#allocation7 + $0x560] sm:$0xff] }
 0x25c   : > { %v1139_v23 = vmul.f32 %v1123_v58, %v2628_v20  ;;  %v1021_v29 = vmul.f32 %v1005_v1, %v2628_v20  ;;  %v1434_v47 = vmul.f32 %v1418_v26, %v2628_v20  ;;  %v1375_v28 = vmul.f32 %v1359_v39, %v2628_v20 }
 0x25d   : > { %v1213_v54 = vadd.f32 %v1212_v3, %v1198_v18  ;;  %v1095_v32 = vadd.f32 %v1094_v42, %v1080_v21  ;;  %v977_v31 = vadd.f32 %v976_v43, %v962_v7  ;;  %v1272_v30 = vadd.f32 %v1271_v2, %v1257_v62  ;;  %v1596_v7 = vld [vmem:[#allocation7 + $0x5f0] sm:$0xff]  ;;  %v1476_v62 = vld [vmem:[#allocation7 + $0x4e0] sm:$0xff] }
 0x25e   : > { %v1154_v44 = vadd.f32 %v1153_v25, %v1139_v23  ;;  %v1036_v45 = vadd.f32 %v1035_v11, %v1021_v29  ;;  %v1449_v6 = vadd.f32 %v1448_v48, %v1434_v47  ;;  %v1390_v35 = vadd.f32 %v1389_v24, %v1375_v28 }
 0x25f   : > { %v1214_v59 = vadd.f32 %v1213_v54, %v1199_v63  ;;  %v1096_v50 = vadd.f32 %v1095_v32, %v1081_v0  ;;  %v978_v56 = vadd.f32 %v977_v31, %v963_v27  ;;  %v1273_v5 = vadd.f32 %v1272_v30, %v1258_v40  ;;  %v1594_v40 = vld [vmem:[#allocation7 + $0x5e0] sm:$0xff]  ;;  %v1537_v54 = vld [vmem:[#allocation7 + $0x570] sm:$0xff] }
 0x260   : > { %v1155_v10 = vadd.f32 %v1154_v44, %v1140_v55  ;;  %v1037_v22 = vadd.f32 %v1036_v45, %v1022_v52  ;;  %v1450_v13 = vadd.f32 %v1449_v6, %v1435_v15  ;;  %v1391_v33 = vadd.f32 %v1390_v35, %v1376_v60  ;;  %v1301_v60 = vld [vmem:[#allocation7 + $0x370] sm:$0xff] }
 0x261   : > { %v1215_v34 = vadd.f32 %v1214_v59, %v1200_v57  ;;  %v1097_v14 = vadd.f32 %v1096_v50, %v1082_v16  ;;  %v979_v3 = vadd.f32 %v978_v56, %v964_v61  ;;  %v1274_v42 = vadd.f32 %v1273_v5, %v1259_v49 }
 0x262   : > { %v1156_v43 = vadd.f32 %v1155_v10, %v1141_v51  ;;  %v1038_v2 = vadd.f32 %v1037_v22, %v1023_v17  ;;  %v1436_v25 = vmul.f32 %v1420_v8, %v2613_v41  ;;  %v1377_v11 = vmul.f32 %v1361_v9, %v2613_v41  ;;  %v1302_v8 = vld [vmem:[#allocation7 + $0x378] sm:$0xff]  ;;  %v1478_v10 = vld [vmem:[#allocation7 + $0x4f0] sm:$0xff] }
 0x263   : > { %v1216_v63 = vrot.slane %v1215_v34, 4  ;;  %v1098_v48 = vrot.slane %v1097_v14, 4  ;;  %v980_v0 = vrot.slane %v979_v3, 4  ;;  %v1275_v27 = vrot.slane %v1274_v42, 4 }
 0x264   : > { %v1157_v58 = vrot.slane %v1156_v43, 4  ;;  %v1039_v55 = vrot.slane %v1038_v2, 4  ;;  %v1451_v52 = vadd.f32 %v1450_v13, %v1436_v25  ;;  %v1392_v15 = vadd.f32 %v1391_v33, %v1377_v11  ;;  %v1300_v13 = vld [vmem:[#allocation7 + $0x368] sm:$0xff] }
 0x265   : > { %v1217_v57 = vadd.f32 %v1216_v63, %v1215_v34  ;;  %v1099_v16 = vadd.f32 %v1098_v48, %v1097_v14  ;;  %v981_v1 = vadd.f32 %v980_v0, %v979_v3  ;;  %v1276_v26 = vadd.f32 %v1275_v27, %v1274_v42  ;;  %v1595_v33 = vld [vmem:[#allocation7 + $0x5e8] sm:$0xff]  ;;  %v1597_v0 = vld [vmem:[#allocation7 + $0x5f8] sm:$0xff] }
 0x266   : > { %v1158_v39 = vadd.f32 %v1157_v58, %v1156_v43  ;;  %v1040_v24 = vadd.f32 %v1039_v55, %v1038_v2  ;;  %v1610_v61 = vmul.f32 %v1594_v40, %v2581_v4  ;;  %v1551_v49 = vmul.f32 %v1535_v53, %v2581_v4  ;;  %v1536_v34 = vld [vmem:[#allocation7 + $0x568] sm:$0xff] }
 0x267   : > { %v1218_v51 = vrot.slane %v1217_v57, 2  ;;  %v1100_v17 = vrot.slane %v1099_v16, 2  ;;  %v982_v18 = vrot.slane %v981_v1, 2  ;;  %v1317_v21 = vmul.f32 %v1301_v60, %v2598_v19 }
 0x268   : > { %v1277_v23 = vrot.slane %v1276_v26, 2  ;;  %v1452_v29 = vrot.slane %v1451_v52, 4  ;;  %v1393_v47 = vrot.slane %v1392_v15, 4  ;;  %v1330_v28 = vadd.f32 %v2602_v36, %v2618_v12 }
 0x269   : > { %v1219_v32 = vadd.f32 %v1218_v51, %v1217_v57  ;;  %v1101_v31 = vadd.f32 %v1100_v17, %v1099_v16  ;;  %v983_v30 = vadd.f32 %v982_v18, %v981_v1  ;;  %v1159_v44 = vrot.slane %v1158_v39, 2 }
 0x26a   : > { %v1041_v45 = vrot.slane %v1040_v24, 2  ;;  %v1612_v6 = vmul.f32 %v1596_v7, %v2598_v19  ;;  %v1625_v35 = vadd.f32 %v2604_v37, %v1610_v61  ;;  %v1492_v59 = vmul.f32 %v1476_v62, %v2581_v4  ;;  %v1477_v4 = vld [vmem:[#allocation7 + $0x4e8] sm:$0xff] }
 0x26b   : > { %v1220_v50 = vrot.slane %v1219_v32, 1  ;;  %v1102_v56 = vrot.slane %v1101_v31, 1  ;;  %v984_v5 = vrot.slane %v983_v30, 1  ;;  %v1553_v9 = vmul.f32 %v1537_v54, %v2598_v19 }
 0x26c   : > { %v1278_v36 = vadd.f32 %v1277_v23, %v1276_v26  ;;  %v1453_v12 = vadd.f32 %v1452_v29, %v1451_v52  ;;  %v1394_v22 = vadd.f32 %v1393_v47, %v1392_v15  ;;  %v1566_v14 = vadd.f32 %v2606_v38, %v1551_v49  ;;  %v1538_v38 = vld [vmem:[#allocation7 + $0x578] sm:$0xff] }
 0x26d   : > { %v1221_v3 = vadd.f32 %v1220_v50, %v1219_v32  ;;  %v1103_v42 = vadd.f32 %v1102_v56, %v1101_v31  ;;  %v985_v37 = vadd.f32 %v984_v5, %v983_v30  ;;  %v1160_v43 = vadd.f32 %v1159_v44, %v1158_v39  ;;  %v1479_v52 = vld [vmem:[#allocation7 + $0x4f8] sm:$0xff] }
 0x26e   : > { %v1042_v2 = vadd.f32 %v1041_v45, %v1040_v24  ;;  %v1318_v25 = vmul.f32 %v1302_v8, %v2613_v41  ;;  %v1494_v11 = vmul.f32 %v1478_v10, %v2598_v19  ;;  %v1507_v63 = vadd.f32 %v2608_v46, %v1492_v59 }
 0x26f   : > { %1222 = vadd.xlane.f32.xlu2 %v1221_v3  ;;  %1104 = vadd.xlane.f32.xlu1 %v1103_v42  ;;  %v1316_v48 = vmul.f32 %v1300_v13, %v2628_v20  ;;  %v1611_v27 = vmul.f32 %v1595_v33, %v2628_v20  ;;  %v1552_v40 = vmul.f32 %v1536_v34, %v2628_v20  ;;  %v1279_v53 = vrot.slane %v1278_v36, 1 }
 0x270   : > { %986 = vadd.xlane.f32.xlu0 %v985_v37  ;;  %v1454_v58 = vrot.slane %v1453_v12, 2  ;;  %v1395_v55 = vrot.slane %v1394_v22, 2  ;;  %v1493_v15 = vmul.f32 %v1477_v4, %v2628_v20  ;;  %v1161_v19 = vrot.slane %v1160_v43, 1 }
 0x271   : > { %v1331_v60 = vadd.f32 %v1330_v28, %v1316_v48  ;;  %v1626_v46 = vadd.f32 %v1625_v35, %v1611_v27  ;;  %v1567_v57 = vadd.f32 %v1566_v14, %v1552_v40  ;;  %v1043_v16 = vrot.slane %v1042_v2, 1 }
 0x272   : > { %v1613_v1 = vmul.f32 %v1597_v0, %v2613_v41  ;;  %v1554_v26 = vmul.f32 %v1538_v38, %v2613_v41  ;;  %v1508_v39 = vadd.f32 %v1507_v63, %v1493_v15  ;;  %v1495_v51 = vmul.f32 %v1479_v52, %v2613_v41  ;;  %v932_v0 = vld [vmem:[%s2709_s8] sm:$0x1] }
 0x273   : > { %v1332_v24 = vadd.f32 %v1331_v60, %v1317_v21  ;;  %v1627_v61 = vadd.f32 %v1626_v46, %v1612_v6  ;;  %v1568_v49 = vadd.f32 %v1567_v57, %v1553_v9  ;;  %v1280_v17 = vadd.f32 %v1279_v53, %v1278_v36 }
 0x274   : > { %v1455_v18 = vadd.f32 %v1454_v58, %v1453_v12  ;;  %v1396_v7 = vadd.f32 %v1395_v55, %v1394_v22  ;;  %v1509_v62 = vadd.f32 %v1508_v39, %v1494_v11  ;;  %v1162_v20 = vadd.f32 %v1161_v19, %v1160_v43 }
 0x275   : > { %v1333_v23 = vadd.f32 %v1332_v24, %v1318_v25  ;;  %v1628_v29 = vadd.f32 %v1627_v61, %v1613_v1  ;;  %v1569_v47 = vadd.f32 %v1568_v49, %v1554_v26  ;;  %v1044_v28 = vadd.f32 %v1043_v16, %v1042_v2 }
 0x276   : > { %v1510_v54 = vadd.f32 %v1509_v62, %v1495_v51  ;;  %v1456_v21 = vrot.slane %v1455_v18, 1  ;;  %v1397_v44 = vrot.slane %v1396_v7, 1  ;;  %v930_v2 = vlaneseq }
 0x277   : > { %1281 = vadd.xlane.f32.xlu2 %v1280_v17  ;;  %1163 = vadd.xlane.f32.xlu1 %v1162_v20  ;;  %v1334_v32 = vrot.slane %v1333_v23, 4  ;;  %v1629_v31 = vrot.slane %v1628_v29, 4  ;;  %v1570_v30 = vrot.slane %v1569_v47, 4 }
 0x278   : > { %1045 = vadd.xlane.f32.xlu0 %v1044_v28  ;;  %v1511_v45 = vrot.slane %v1510_v54, 4  ;;  %v1457_v8 = vadd.f32 %v1456_v21, %v1455_v18  ;;  %v1398_v9 = vadd.f32 %v1397_v44, %v1396_v7  ;;  %v931_v25 = vand.u32 127, %v930_v2 }
 0x279   : > { %v1335_v41 = vadd.f32 %v1334_v32, %v1333_v23  ;;  %v1630_v6 = vadd.f32 %v1629_v31, %v1628_v29  ;;  %v1571_v35 = vadd.f32 %v1570_v30, %v1569_v47 }
 0x27a   : > { %v1512_v59 = vadd.f32 %v1511_v45, %v1510_v54  ;;  %vm988_vm1 = vcmp.eq.s32.totalorder %v931_v25, 0  ;;  %vm1047_vm2 = vcmp.eq.s32.totalorder %v931_v25, 1  ;;  %vm1106_vm3 = vcmp.eq.s32.totalorder %v931_v25, 2 }
 0x27b   : > { %v1336_v50 = vrot.slane %v1335_v41, 2  ;;  %v1631_v56 = vrot.slane %v1630_v6, 2  ;;  %v1572_v5 = vrot.slane %v1571_v35, 2  ;;  %vm1165_vm4 = vcmp.eq.s32.totalorder %v931_v25, 3 }
 0x27c   : > { %v1513_v22 = vrot.slane %v1512_v59, 2  ;;  %vm1224_vm5 = vcmp.eq.s32.totalorder %v931_v25, 4  ;;  %vm1283_vm6 = vcmp.eq.s32.totalorder %v931_v25, 5  ;;  %vm1342_vm7 = vcmp.eq.s32.totalorder %v931_v25, 6 }
 0x27d   : > { %v1337_v10 = vadd.f32 %v1336_v50, %v1335_v41  ;;  %v1632_v36 = vadd.f32 %v1631_v56, %v1630_v6  ;;  %v1573_v12 = vadd.f32 %v1572_v5, %v1571_v35  ;;  %vm1401_vm8 = vcmp.eq.s32.totalorder %v931_v25, 7 }
 0x27e   : > { %v1514_v3 = vadd.f32 %v1513_v22, %v1512_v59  ;;  %vm1460_vm9 = vcmp.eq.s32.totalorder %v931_v25, 8  ;;  %vm1519_vm10 = vcmp.eq.s32.totalorder %v931_v25, 9  ;;  %vm1578_vm11 = vcmp.eq.s32.totalorder %v931_v25, 10 }
 0x27f   : > { %1458 = vadd.xlane.f32.xlu2 %v1457_v8  ;;  %1399 = vadd.xlane.f32.xlu1 %v1398_v9  ;;  %v1338_v13 = vrot.slane %v1337_v10, 1  ;;  %v1633_v34 = vrot.slane %v1632_v36, 1  ;;  %v1574_v14 = vrot.slane %v1573_v12, 1  ;;  %vm1637_vm12 = vcmp.eq.s32.totalorder %v931_v25, 11 }
 0x280   : > { %v1515_v43 = vrot.slane %v1514_v3, 1 }
 0x281   : > { %v1339_v33 = vadd.f32 %v1338_v13, %v1337_v10  ;;  %v1634_v42 = vadd.f32 %v1633_v34, %v1632_v36  ;;  %v1575_v37 = vadd.f32 %v1574_v14, %v1573_v12 }
 0x282   : > { %v1516_v4 = vadd.f32 %v1515_v43, %v1514_v3 }
 0x283   : > { %1340 = vadd.xlane.f32.xlu0 %v1339_v33 }
 0x287   : > { %1635 = vadd.xlane.f32.xlu2 %v1634_v42  ;;  %1576 = vadd.xlane.f32.xlu1 %v1575_v37 }
 0x28b   : > { %1517 = vadd.xlane.f32.xlu0 %v1516_v4 }
 0x2e2   : > { %v1223_v11 = vpop.xlane.xlu2 %1222  ;;  %v1105_v63 = vpop.xlane.xlu1 %1104 }
 0x2e3   : > { %v987_v48 = vpop.xlane.xlu0 %986  ;;  %v1107_v15 = vsel %vm1106_vm3, %v1105_v63, 0.0  ;;  %v1225_v57 = vsel %vm1224_vm5, %v1223_v11, 0.0 }
 0x2e4   : > { %v989_v27 = vsel %vm988_vm1, %v987_v48, 0.0 }
 0x2e5   : > { %v990_v40 = vadd.f32 %v989_v27, %v932_v0 }
 0x2ea   : > { %v1164_v38 = vpop.xlane.xlu1 %1163  ;;  %v1282_v58 = vpop.xlane.xlu2 %1281 }
 0x2eb   : > { %v1046_v53 = vpop.xlane.xlu0 %1045  ;;  %v1166_v60 = vsel %vm1165_vm4, %v1164_v38, 0.0  ;;  %v1284_v1 = vsel %vm1283_vm6, %v1282_v58, 0.0 }
 0x2ec   : > { %v1048_v55 = vsel %vm1047_vm2, %v1046_v53, 0.0 }
 0x2ed   : > { %v1049_v52 = vadd.f32 %v1048_v55, %v990_v40 }
 0x2ef   : > { %v1108_v19 = vadd.f32 %v1107_v15, %v1049_v52 }
 0x2f1   : > { %v1167_v46 = vadd.f32 %v1166_v60, %v1108_v19 }
 0x2f2   : > { %v1400_v26 = vpop.xlane.xlu1 %1399  ;;  %v1459_v24 = vpop.xlane.xlu2 %1458 }
 0x2f3   : > { %v1226_v16 = vadd.f32 %v1225_v57, %v1167_v46  ;;  %v1402_v17 = vsel %vm1401_vm8, %v1400_v26, 0.0  ;;  %v1461_v7 = vsel %vm1460_vm9, %v1459_v24, 0.0 }
 0x2f5   : > { %v1285_v39 = vadd.f32 %v1284_v1, %v1226_v16 }
 0x2f6   : > { %v1341_v61 = vpop.xlane.xlu0 %1340 }
 0x2f7   : > { %v1343_v49 = vsel %vm1342_vm7, %v1341_v61, 0.0 }
 0x2f8   : > { %v1344_v51 = vadd.f32 %v1343_v49, %v1285_v39 }
 0x2fa   : > { %v1403_v18 = vadd.f32 %v1402_v17, %v1344_v51  ;;  %v1577_v20 = vpop.xlane.xlu1 %1576  ;;  %v1636_v47 = vpop.xlane.xlu2 %1635 }
 0x2fb   : > { %v1579_v54 = vsel %vm1578_vm11, %v1577_v20, 0.0  ;;  %v1638_v31 = vsel %vm1637_vm12, %v1636_v47, 0.0 }
 0x2fc   : > { %v1462_v62 = vadd.f32 %v1461_v7, %v1403_v18 }
 0x2fe   : > { %v1518_v23 = vpop.xlane.xlu0 %1517 }
 0x2ff   : > { %v1520_v29 = vsel %vm1519_vm10, %v1518_v23, 0.0 }
 0x300   : > { %v1521_v28 = vadd.f32 %v1520_v29, %v1462_v62 }
 0x302   : > { %v1580_v32 = vadd.f32 %v1579_v54, %v1521_v28 }
 0x304   : > { %v1639_v30 = vadd.f32 %v1638_v31, %v1580_v32 }
 0x306   : > { %1641 = vst.msk [vmem:[%s374_s17] sm:$0x1] %vm1640_vm13, %v1639_v30 }
 0x307   : > { %2005 = shalt.err (!%p2002_p8)
}
 0x308   : > { %1824 = dma.vmem_to_hbm [thread:$0]  (%p2143_p5), %s1654_s22, 16, %s1656_s23, %s1643_s25  }
 0x309 PF: > { %p1846_p9 = scmp.ge.s32.totalorder %s2048_s12, 2  ;;  %s1667_s27 = sand.u32 1, %s2036_s30  }
 0x30a   : > { %s1668_s28 = scalar_lea.sflag [#allocation4], %s1667_s27 }
 0x30b   : > { %p1837_p10 = pnand %p1846_p9, %p2147_p6 }
 0x30d   : > { %p1838_p11 = pneg %p1837_p10 }
 0x30f   : > { %2031 = dma.done.wait (%p1838_p11), %s1668_s28, 16  }
 0x310   : > { %2033 = vsyncadd (%p1838_p11), %s1668_s28, 4294967280  ;;  %s2720_s29 = sld [smem:[#allocation12_spill]]  ;;  %p21_p12 = scmp.ge.s32.totalorder %s2130_s15, 4  }
 0x311   : > { %s2721_s30 = smov %s2040_s10  ;;  %s2722_s10 = smov %s2044_s11 }
 0x312   : > { %s2724_s12 = smov %s2130_s15  ;;  %23 = sbr.rel (!%p21_p12) target bundleno = 8 (0x8), region = 115 }
 0x316   : > { %s2723_s11 = smov %s2720_s29 }
 0x317   :  { %1673 = vsyncpa [#allocation3], 1 }
 0x318   :  { %1675 = vsyncpa [#allocation3 + $0x1], 1 }
 0x319   :  { %1676 = vsyncpa [#allocation6], 1 }
 0x31a   :  { %1677 = vsyncpa [#allocation4], 1 }
 0x31b   :  { %1679 = vsyncpa [#allocation4 + $0x1], 1 }

</bundles_post_ra>
